<compile_context>
chip_gen: v7x
topology: tpu7x:2x2x1
jax: 0.10.0
libtpu: 0.0.40
codegen_flags: <defaults>
</compile_context>

<pallas_src>
import functools

import jax
import jax.numpy as jnp
from jax import lax
from jax.experimental import pallas as pl
from jax.experimental.pallas import tpu as pltpu


def _erf_f32(x):
    # Abramowitz & Stegun 7.1.26, max abs error ~1.5e-7; only mul/add/div/exp/where.
    a = jnp.abs(x)
    t = 1.0 / (1.0 + 0.3275911 * a)
    poly = t * (0.254829592 + t * (-0.284496736 + t * (1.421413741
               + t * (-1.453152027 + t * 1.061405429))))
    y = 1.0 - poly * jnp.exp(-(a * a))
    return jnp.where(x < 0.0, -y, y)


def _gelu_exact(x):
    # nn.GELU() default = exact (erf-based) GELU
    return 0.5 * x * (1.0 + _erf_f32(x * (2.0 ** -0.5)))


def _upsample_kernel(x_ref, w1_ref, b1_ref, w2_ref, b2_ref, wc_ref, bc4_ref, o_ref,
                     *, T, Hp):
    """One grid step: a (M, Hp) slab of flattened (batch, time) rows.

    w1_ref / w2_ref : fused ConvTranspose1d taps  [w(k=1) | w(k=2) | w(k=0)]  -> (Hp, 3Hp)
    wc_ref          : fused Conv1d taps           [w(k=0) | w(k=1) | w(k=2)]  -> (Hp, 3Hp)
    Output lanes hold the 4 time phases side by side: (M, 4*Hp).
    """
    M = x_ref.shape[0]
    x = x_ref[...].astype(jnp.float32)                      # (M, Hp)

    # Hoisted batch-boundary masks for the +-1 time shifts (row r = (b, t=r%T)).
    t_idx = lax.broadcasted_iota(jnp.int32, (M, Hp), 0) % T
    up_ok = t_idx != (T - 1)        # row r may read row r+1 (same batch element)
    dn_ok = t_idx != 0              # row r may read row r-1

    def shift_up(a):                # a[r] <- a[r+1], zero at end of each time segment
        return jnp.where(up_ok, pltpu.roll(a, shift=(-1) % M, axis=0), 0.0)

    def shift_dn(a):                # a[r] <- a[r-1], zero at start of each segment
        return jnp.where(dn_ok, pltpu.roll(a, shift=1, axis=0), 0.0)

    # ---- ConvTranspose1d #1 (k=3, s=2, p=1, output_padding=1) ----
    #   y[2j]   = x[j]@w1 ;  y[2j+1] = x[j]@w2 + x[j+1]@w0
    u = jnp.dot(x, w1_ref[...], preferred_element_type=jnp.float32)          # (M, 3Hp)
    b1 = b1_ref[...]
    y_even = _gelu_exact(u[:, 0:Hp] + b1)
    y_odd = _gelu_exact(u[:, Hp:2 * Hp] + shift_up(u[:, 2 * Hp:3 * Hp]) + b1)

    # ---- ConvTranspose1d #2 (same layer type), 4 output phases mod 4 ----
    ue = jnp.dot(y_even, w2_ref[...], preferred_element_type=jnp.float32)    # (M, 3Hp)
    uo = jnp.dot(y_odd, w2_ref[...], preferred_element_type=jnp.float32)
    b2 = b2_ref[...]
    z0 = _gelu_exact(ue[:, 0:Hp] + b2)                                        # z[4j]
    z1 = _gelu_exact(ue[:, Hp:2 * Hp] + uo[:, 2 * Hp:3 * Hp] + b2)            # z[4j+1]
    z2 = _gelu_exact(uo[:, 0:Hp] + b2)                                        # z[4j+2]
    z3 = _gelu_exact(uo[:, Hp:2 * Hp] + shift_up(ue[:, 2 * Hp:3 * Hp]) + b2)  # z[4j+3]

    # ---- Conv1d (k=3, s=1, p=1):  out[t] = z[t-1]@wc0 + z[t]@wc1 + z[t+1]@wc2 ----
    a0 = jnp.dot(z0, wc_ref[...], preferred_element_type=jnp.float32)        # (M, 3Hp)
    a1 = jnp.dot(z1, wc_ref[...], preferred_element_type=jnp.float32)
    a2 = jnp.dot(z2, wc_ref[...], preferred_element_type=jnp.float32)
    a3 = jnp.dot(z3, wc_ref[...], preferred_element_type=jnp.float32)
    o0 = shift_dn(a3[:, 0:Hp]) + a0[:, Hp:2 * Hp] + a1[:, 2 * Hp:3 * Hp]      # out[4j]
    o1 = a0[:, 0:Hp] + a1[:, Hp:2 * Hp] + a2[:, 2 * Hp:3 * Hp]                # out[4j+1]
    o2 = a1[:, 0:Hp] + a2[:, Hp:2 * Hp] + a3[:, 2 * Hp:3 * Hp]                # out[4j+2]
    o3 = a2[:, 0:Hp] + a3[:, Hp:2 * Hp] + shift_up(a0[:, 2 * Hp:3 * Hp])      # out[4j+3]

    out = jnp.concatenate([o0, o1, o2, o3], axis=1) + bc4_ref[...]            # (M, 4Hp)
    o_ref[...] = out.astype(o_ref.dtype)


def _round_up(v, m):
    return ((v + m - 1) // m) * m


def _pick_block_batch(B, T, target_rows=256):
    """Largest batch tile whose row count fits the target, divides B, keeps the
    block sublane-aligned, and leaves >=2 grid steps when possible (v7x 2 TCs)."""
    best, best_key = B, None
    for bb in range(1, B + 1):
        if B % bb:
            continue
        rows = bb * T
        key = (
            0 if (rows % 8 == 0 or bb == B) else 1,        # legal / dense sublane tiles
            0 if (B // bb >= 2 or B == 1) else 1,          # keep both v7x TensorCores busy
            0 if rows <= target_rows else 1,               # stay within a modest VMEM budget
            -rows if rows <= target_rows else rows,        # then as large as possible
        )
        if best_key is None or key < best_key:
            best, best_key = bb, key
    return best


def pack_params_for_kernel(pt_params):
    """PyTorch-layout weights -> lane-padded, tap-fused kernel weights.

    ConvTranspose1d weight is (Cin, Cout, K); Conv1d weight is (Cout, Cin, K).
    Each tap becomes an (Hp, Hp) [Cin, Cout] block, zero-padded to Hp lanes,
    and the 3 taps of a layer are concatenated along Cout (lane axis).
    """
    wt1_pt, b1, wt2_pt, b2, wc_pt, bc = pt_params
    H = b1.shape[0]
    Hp = _round_up(H, 128)

    def pad2(m):  # (H, H) -> (Hp, Hp)
        return jnp.pad(m, ((0, Hp - H), (0, Hp - H)))

    def pad1(v):  # (H,) -> (Hp,)
        return jnp.pad(v, (0, Hp - H))

    def fuse_tconv(w_pt):  # taps in the order they are consumed: [k=1 | k=2 | k=0]
        return jnp.concatenate(
            [pad2(w_pt[:, :, 1]), pad2(w_pt[:, :, 2]), pad2(w_pt[:, :, 0])], axis=1)

    wcf = jnp.concatenate(
        [pad2(wc_pt[:, :, 0].T), pad2(wc_pt[:, :, 1].T), pad2(wc_pt[:, :, 2].T)], axis=1)

    return {
        "w1": fuse_tconv(wt1_pt), "b1": pad1(b1)[None, :],
        "w2": fuse_tconv(wt2_pt), "b2": pad1(b2)[None, :],
        "wc": wcf, "bc4": jnp.tile(pad1(bc)[None, :], (1, 4)),
        "H": H, "Hp": Hp,
    }


def conv1d_upsampling(x, params):
    """x: (B, T, H) float32 -> (B, 4*T, H), matching Conv1dUpsampling.forward."""
    B, T, H = x.shape
    Hp = params["Hp"]
    assert H == params["H"]

    xp = x if Hp == H else jnp.pad(x, ((0, 0), (0, 0), (0, Hp - H)))
    x2 = xp.reshape(B * T, Hp)                       # flatten (batch, time) into rows

    Bb = _pick_block_batch(B, T)
    Mb = Bb * T
    grid = (B // Bb,)
    kern = functools.partial(_upsample_kernel, T=T, Hp=Hp)

    grid_spec = pltpu.PrefetchScalarGridSpec(
        num_scalar_prefetch=0,
        grid=grid,
        in_specs=[
            pl.BlockSpec((Mb, Hp), lambda i: (i, 0)),            # x slab
            pl.BlockSpec((Hp, 3 * Hp), lambda i: (0, 0)),        # fused tconv1 weights
            pl.BlockSpec((1, Hp), lambda i: (0, 0)),             # b1
            pl.BlockSpec((Hp, 3 * Hp), lambda i: (0, 0)),        # fused tconv2 weights
            pl.BlockSpec((1, Hp), lambda i: (0, 0)),             # b2
            pl.BlockSpec((Hp, 3 * Hp), lambda i: (0, 0)),        # fused conv weights
            pl.BlockSpec((1, 4 * Hp), lambda i: (0, 0)),         # bc tiled over 4 phases
        ],
        out_specs=pl.BlockSpec((Mb, 4 * Hp), lambda i: (i, 0)),  # lane-dense output slab
    )

    out2 = pl.pallas_call(
        kern,
        out_shape=jax.ShapeDtypeStruct((B * T, 4 * Hp), x.dtype),
        grid_spec=grid_spec,
        compiler_params=pltpu.CompilerParams(
            dimension_semantics=("parallel",),
            vmem_limit_bytes=64 << 20),
    )(x2, params["w1"], params["b1"], params["w2"], params["b2"],
      params["wc"], params["bc4"])

    # (B*T, 4*Hp) row-major == (B, 4*T, Hp): the phase interleave is a free reshape.
    out = out2.reshape(B, 4 * T, Hp)
    return out if Hp == H else out[:, :, :H]


def init_params(key, hidden_dim):
    """Deterministic synthetic parameters in PyTorch layouts."""
    ks = jax.random.split(key, 6)
    s = 0.1
    # ConvTranspose1d weight: (Cin, Cout, K); Conv1d weight: (Cout, Cin, K)
    wt1_pt = s * jax.random.normal(ks[0], (hidden_dim, hidden_dim, 3), jnp.float32)
    b1 = s * jax.random.normal(ks[1], (hidden_dim,), jnp.float32)
    wt2_pt = s * jax.random.normal(ks[2], (hidden_dim, hidden_dim, 3), jnp.float32)
    b2 = s * jax.random.normal(ks[3], (hidden_dim,), jnp.float32)
    wc_pt = s * jax.random.normal(ks[4], (hidden_dim, hidden_dim, 3), jnp.float32)
    bc = s * jax.random.normal(ks[5], (hidden_dim,), jnp.float32)
    return (wt1_pt, b1, wt2_pt, b2, wc_pt, bc)


def reference_forward(x, pt_params):
    """Pure-JAX/XLA replica of the PyTorch module (NCL layout internally)."""
    wt1_pt, b1, wt2_pt, b2, wc_pt, bc = pt_params
    h = jnp.transpose(x, (0, 2, 1))                     # (B, H, T)

    def conv_transpose(h, w_pt, b):
        # ConvTranspose1d(k=3,s=2,p=1,op=1) == dilated conv with flipped/transposed kernel
        rhs = jnp.flip(jnp.transpose(w_pt, (1, 0, 2)), axis=2)  # (Cout, Cin, K)
        y = lax.conv_general_dilated(
            h, rhs, window_strides=(1,), padding=[(1, 2)], lhs_dilation=(2,),
            dimension_numbers=("NCH", "OIH", "NCH"))
        return y + b[None, :, None]

    def conv1d(h, w_pt, b):
        y = lax.conv_general_dilated(
            h, w_pt, window_strides=(1,), padding=[(1, 1)],
            dimension_numbers=("NCH", "OIH", "NCH"))
        return y + b[None, :, None]

    h = jax.nn.gelu(conv_transpose(h, wt1_pt, b1), approximate=False)
    h = jax.nn.gelu(conv_transpose(h, wt2_pt, b2), approximate=False)
    h = conv1d(h, wc_pt, bc)
    return jnp.transpose(h, (0, 2, 1))                  # (B, 4T, H)


if __name__ == "__main__":
    key = jax.random.PRNGKey(0)
    for (B, T, H) in [(2, 8, 32), (4, 16, 32)]:
        kx, kp, key = jax.random.split(key, 3)
        x = jax.random.normal(kx, (B, T, H), jnp.float32)
        pt_params = init_params(kp, H)
        params = pack_params_for_kernel(pt_params)

        out = jax.block_until_ready(conv1d_upsampling(x, params))
        ref = jax.block_until_ready(reference_forward(x, pt_params))

        assert out.shape == (B, 4 * T, H), out.shape
        max_err = float(jnp.max(jnp.abs(out - ref)))
        assert jnp.allclose(out, ref, rtol=1e-3, atol=1e-3), max_err
    print("KERNEL_OK")
</pallas_src>

<mosaic_0001>
module attributes {stable_mosaic.version = 11 : i64} {
  func.func @_upsample_kernel(%arg0: i32, %arg1: memref<8x128xf32, #tpu.memory_space<vmem>>, %arg2: memref<128x384xf32, #tpu.memory_space<vmem>>, %arg3: memref<1x128xf32, #tpu.memory_space<vmem>>, %arg4: memref<128x384xf32, #tpu.memory_space<vmem>>, %arg5: memref<1x128xf32, #tpu.memory_space<vmem>>, %arg6: memref<128x384xf32, #tpu.memory_space<vmem>>, %arg7: memref<1x512xf32, #tpu.memory_space<vmem>>, %arg8: memref<8x512xf32, #tpu.memory_space<vmem>>) attributes {dimension_semantics = [#tpu.dimension_semantics<parallel>], iteration_bounds = array<i64: 2>, scalar_prefetch = 0 : i64, scratch_operands = 0 : i64, tpu.core_type = #tpu.core_type<tc>, window_params = [{transform_indices = @transform_0, window_bounds = array<i64: 8, 128>}, {pipeline_mode = #tpu.pipeline_mode<synchronous>, transform_indices = @transform_1, window_bounds = array<i64: 128, 384>}, {pipeline_mode = #tpu.pipeline_mode<synchronous>, transform_indices = @transform_2, window_bounds = array<i64: 1, 128>}, {pipeline_mode = #tpu.pipeline_mode<synchronous>, transform_indices = @transform_3, window_bounds = array<i64: 128, 384>}, {pipeline_mode = #tpu.pipeline_mode<synchronous>, transform_indices = @transform_4, window_bounds = array<i64: 1, 128>}, {pipeline_mode = #tpu.pipeline_mode<synchronous>, transform_indices = @transform_5, window_bounds = array<i64: 128, 384>}, {pipeline_mode = #tpu.pipeline_mode<synchronous>, transform_indices = @transform_6, window_bounds = array<i64: 1, 512>}, {transform_indices = @transform_7, window_bounds = array<i64: 8, 512>}]} {
    %c0 = arith.constant 0 : index
    %c0_0 = arith.constant 0 : index
    %0 = vector.load %arg1[%c0, %c0_0] : memref<8x128xf32, #tpu.memory_space<vmem>>, vector<8x128xf32>
    %1 = tpu.iota {dimensions = array<i32: 0>} : vector<8x128xi32>
    %c8_i32 = arith.constant 8 : i32
    %c0_i32 = arith.constant 0 : i32
    %2 = arith.cmpi eq, %c8_i32, %c0_i32 : i32
    %c1_i32 = arith.constant 1 : i32
    %3 = arith.select %2, %c1_i32, %c8_i32 : i32
    %4 = vector.broadcast %3 : i32 to vector<8x128xi32>
    %5 = arith.remsi %1, %4 : vector<8x128xi32>
    %c0_i32_1 = arith.constant 0 : i32
    %6 = vector.broadcast %c0_i32_1 : i32 to vector<8x128xi32>
    %7 = arith.cmpi ne, %5, %6 : vector<8x128xi32>
    %c0_i32_2 = arith.constant 0 : i32
    %8 = vector.broadcast %c0_i32_2 : i32 to vector<8x128xi32>
    %9 = arith.cmpi slt, %5, %8 : vector<8x128xi32>
    %c0_i32_3 = arith.constant 0 : i32
    %10 = arith.cmpi slt, %3, %c0_i32_3 : i32
    %11 = vector.broadcast %10 : i1 to vector<8x128xi1>
    %12 = vector.broadcast %11 : vector<8x128xi1> to vector<8x128xi1>
    %13 = arith.xori %9, %12 : vector<8x128xi1>
    %14 = arith.andi %13, %7 : vector<8x128xi1>
    %15 = vector.broadcast %3 : i32 to vector<8x128xi32>
    %16 = arith.addi %5, %15 : vector<8x128xi32>
    %17 = arith.select %14, %16, %5 : vector<8x128xi1>, vector<8x128xi32>
    %c7_i32 = arith.constant 7 : i32
    %18 = vector.broadcast %c7_i32 : i32 to vector<8x128xi32>
    %19 = arith.cmpi ne, %17, %18 : vector<8x128xi32>
    %c0_i32_4 = arith.constant 0 : i32
    %20 = vector.broadcast %c0_i32_4 : i32 to vector<8x128xi32>
    %21 = arith.cmpi ne, %17, %20 : vector<8x128xi32>
    %c0_5 = arith.constant 0 : index
    %c0_6 = arith.constant 0 : index
    %22 = vector.load %arg2[%c0_5, %c0_6] : memref<128x384xf32, #tpu.memory_space<vmem>>, vector<128x384xf32>
    %cst = arith.constant dense<0.000000e+00> : vector<8x384xf32>
    %23 = tpu.matmul %0, %22, %cst {dimension_numbers = #tpu.dot_dimension_numbers<[1], [0], [0], [1], [0, 0, 1, 1], [], []>} : vector<8x128xf32>, vector<128x384xf32>, vector<8x384xf32> -> vector<8x384xf32>
    %c0_7 = arith.constant 0 : index
    %c0_8 = arith.constant 0 : index
    %24 = vector.load %arg3[%c0_7, %c0_8] : memref<1x128xf32, #tpu.memory_space<vmem>>, vector<1x128xf32>
    %25 = vector.extract_strided_slice %23 {offsets = [0, 0], sizes = [8, 128], strides = [1, 1]} : vector<8x384xf32> to vector<8x128xf32>
    %26 = vector.broadcast %24 : vector<1x128xf32> to vector<8x128xf32>
    %27 = arith.addf %25, %26 : vector<8x128xf32>
    %cst_9 = arith.constant 5.000000e-01 : f32
    %28 = vector.broadcast %cst_9 : f32 to vector<8x128xf32>
    %29 = arith.mulf %28, %27 : vector<8x128xf32>
    %cst_10 = arith.constant 0.707106769 : f32
    %30 = vector.broadcast %cst_10 : f32 to vector<8x128xf32>
    %31 = arith.mulf %27, %30 : vector<8x128xf32>
    %32 = math.absf %31 : vector<8x128xf32>
    %cst_11 = arith.constant 0.327591091 : f32
    %33 = vector.broadcast %cst_11 : f32 to vector<8x128xf32>
    %34 = arith.mulf %33, %32 : vector<8x128xf32>
    %cst_12 = arith.constant 1.000000e+00 : f32
    %35 = vector.broadcast %cst_12 : f32 to vector<8x128xf32>
    %36 = arith.addf %35, %34 : vector<8x128xf32>
    %cst_13 = arith.constant 1.000000e+00 : f32
    %37 = vector.broadcast %cst_13 : f32 to vector<8x128xf32>
    %38 = arith.divf %37, %36 : vector<8x128xf32>
    %cst_14 = arith.constant 1.06140542 : f32
    %39 = vector.broadcast %cst_14 : f32 to vector<8x128xf32>
    %40 = arith.mulf %38, %39 : vector<8x128xf32>
    %cst_15 = arith.constant -1.45315206 : f32
    %41 = vector.broadcast %cst_15 : f32 to vector<8x128xf32>
    %42 = arith.addf %41, %40 : vector<8x128xf32>
    %43 = arith.mulf %38, %42 : vector<8x128xf32>
    %cst_16 = arith.constant 1.42141378 : f32
    %44 = vector.broadcast %cst_16 : f32 to vector<8x128xf32>
    %45 = arith.addf %44, %43 : vector<8x128xf32>
    %46 = arith.mulf %38, %45 : vector<8x128xf32>
    %cst_17 = arith.constant -0.284496725 : f32
    %47 = vector.broadcast %cst_17 : f32 to vector<8x128xf32>
    %48 = arith.addf %47, %46 : vector<8x128xf32>
    %49 = arith.mulf %38, %48 : vector<8x128xf32>
    %cst_18 = arith.constant 0.254829586 : f32
    %50 = vector.broadcast %cst_18 : f32 to vector<8x128xf32>
    %51 = arith.addf %50, %49 : vector<8x128xf32>
    %52 = arith.mulf %38, %51 : vector<8x128xf32>
    %53 = arith.mulf %32, %32 : vector<8x128xf32>
    %cst_19 = arith.constant 0.000000e+00 : f32
    %54 = vector.broadcast %cst_19 : f32 to vector<8x128xf32>
    %55 = arith.subf %54, %53 : vector<8x128xf32>
    %56 = math.exp %55 : vector<8x128xf32>
    %57 = arith.mulf %52, %56 : vector<8x128xf32>
    %cst_20 = arith.constant 1.000000e+00 : f32
    %58 = vector.broadcast %cst_20 : f32 to vector<8x128xf32>
    %59 = arith.subf %58, %57 : vector<8x128xf32>
    %cst_21 = arith.constant 0.000000e+00 : f32
    %60 = vector.broadcast %cst_21 : f32 to vector<8x128xf32>
    %61 = arith.cmpf olt, %31, %60 : vector<8x128xf32>
    %cst_22 = arith.constant 0.000000e+00 : f32
    %62 = vector.broadcast %cst_22 : f32 to vector<8x128xf32>
    %63 = arith.subf %62, %59 : vector<8x128xf32>
    %64 = arith.select %61, %63, %59 : vector<8x128xi1>, vector<8x128xf32>
    %cst_23 = arith.constant 1.000000e+00 : f32
    %65 = vector.broadcast %cst_23 : f32 to vector<8x128xf32>
    %66 = arith.addf %65, %64 : vector<8x128xf32>
    %67 = arith.mulf %29, %66 : vector<8x128xf32>
    %68 = vector.extract_strided_slice %23 {offsets = [0, 128], sizes = [8, 128], strides = [1, 1]} : vector<8x384xf32> to vector<8x128xf32>
    %69 = vector.extract_strided_slice %23 {offsets = [0, 256], sizes = [8, 128], strides = [1, 1]} : vector<8x384xf32> to vector<8x128xf32>
    %c7_i32_24 = arith.constant 7 : i32
    %70 = tpu.dynamic_rotate %69 by %c7_i32_24 dim 0 : vector<8x128xf32>, i32 -> vector<8x128xf32>
    %cst_25 = arith.constant 0.000000e+00 : f32
    %71 = vector.broadcast %cst_25 : f32 to vector<8x128xf32>
    %72 = arith.select %19, %70, %71 : vector<8x128xi1>, vector<8x128xf32>
    %73 = arith.addf %68, %72 : vector<8x128xf32>
    %74 = vector.broadcast %24 : vector<1x128xf32> to vector<8x128xf32>
    %75 = arith.addf %73, %74 : vector<8x128xf32>
    %cst_26 = arith.constant 5.000000e-01 : f32
    %76 = vector.broadcast %cst_26 : f32 to vector<8x128xf32>
    %77 = arith.mulf %76, %75 : vector<8x128xf32>
    %cst_27 = arith.constant 0.707106769 : f32
    %78 = vector.broadcast %cst_27 : f32 to vector<8x128xf32>
    %79 = arith.mulf %75, %78 : vector<8x128xf32>
    %80 = math.absf %79 : vector<8x128xf32>
    %cst_28 = arith.constant 0.327591091 : f32
    %81 = vector.broadcast %cst_28 : f32 to vector<8x128xf32>
    %82 = arith.mulf %81, %80 : vector<8x128xf32>
    %cst_29 = arith.constant 1.000000e+00 : f32
    %83 = vector.broadcast %cst_29 : f32 to vector<8x128xf32>
    %84 = arith.addf %83, %82 : vector<8x128xf32>
    %cst_30 = arith.constant 1.000000e+00 : f32
    %85 = vector.broadcast %cst_30 : f32 to vector<8x128xf32>
    %86 = arith.divf %85, %84 : vector<8x128xf32>
    %cst_31 = arith.constant 1.06140542 : f32
    %87 = vector.broadcast %cst_31 : f32 to vector<8x128xf32>
    %88 = arith.mulf %86, %87 : vector<8x128xf32>
    %cst_32 = arith.constant -1.45315206 : f32
    %89 = vector.broadcast %cst_32 : f32 to vector<8x128xf32>
    %90 = arith.addf %89, %88 : vector<8x128xf32>
    %91 = arith.mulf %86, %90 : vector<8x128xf32>
    %cst_33 = arith.constant 1.42141378 : f32
    %92 = vector.broadcast %cst_33 : f32 to vector<8x128xf32>
    %93 = arith.addf %92, %91 : vector<8x128xf32>
    %94 = arith.mulf %86, %93 : vector<8x128xf32>
    %cst_34 = arith.constant -0.284496725 : f32
    %95 = vector.broadcast %cst_34 : f32 to vector<8x128xf32>
    %96 = arith.addf %95, %94 : vector<8x128xf32>
    %97 = arith.mulf %86, %96 : vector<8x128xf32>
    %cst_35 = arith.constant 0.254829586 : f32
    %98 = vector.broadcast %cst_35 : f32 to vector<8x128xf32>
    %99 = arith.addf %98, %97 : vector<8x128xf32>
    %100 = arith.mulf %86, %99 : vector<8x128xf32>
    %101 = arith.mulf %80, %80 : vector<8x128xf32>
    %cst_36 = arith.constant 0.000000e+00 : f32
    %102 = vector.broadcast %cst_36 : f32 to vector<8x128xf32>
    %103 = arith.subf %102, %101 : vector<8x128xf32>
    %104 = math.exp %103 : vector<8x128xf32>
    %105 = arith.mulf %100, %104 : vector<8x128xf32>
    %cst_37 = arith.constant 1.000000e+00 : f32
    %106 = vector.broadcast %cst_37 : f32 to vector<8x128xf32>
    %107 = arith.subf %106, %105 : vector<8x128xf32>
    %cst_38 = arith.constant 0.000000e+00 : f32
    %108 = vector.broadcast %cst_38 : f32 to vector<8x128xf32>
    %109 = arith.cmpf olt, %79, %108 : vector<8x128xf32>
    %cst_39 = arith.constant 0.000000e+00 : f32
    %110 = vector.broadcast %cst_39 : f32 to vector<8x128xf32>
    %111 = arith.subf %110, %107 : vector<8x128xf32>
    %112 = arith.select %109, %111, %107 : vector<8x128xi1>, vector<8x128xf32>
    %cst_40 = arith.constant 1.000000e+00 : f32
    %113 = vector.broadcast %cst_40 : f32 to vector<8x128xf32>
    %114 = arith.addf %113, %112 : vector<8x128xf32>
    %115 = arith.mulf %77, %114 : vector<8x128xf32>
    %c0_41 = arith.constant 0 : index
    %c0_42 = arith.constant 0 : index
    %116 = vector.load %arg4[%c0_41, %c0_42] : memref<128x384xf32, #tpu.memory_space<vmem>>, vector<128x384xf32>
    %cst_43 = arith.constant dense<0.000000e+00> : vector<8x384xf32>
    %117 = tpu.matmul %67, %116, %cst_43 {dimension_numbers = #tpu.dot_dimension_numbers<[1], [0], [0], [1], [0, 0, 1, 1], [], []>} : vector<8x128xf32>, vector<128x384xf32>, vector<8x384xf32> -> vector<8x384xf32>
    %c0_44 = arith.constant 0 : index
    %c0_45 = arith.constant 0 : index
    %118 = vector.load %arg4[%c0_44, %c0_45] : memref<128x384xf32, #tpu.memory_space<vmem>>, vector<128x384xf32>
    %cst_46 = arith.constant dense<0.000000e+00> : vector<8x384xf32>
    %119 = tpu.matmul %115, %118, %cst_46 {dimension_numbers = #tpu.dot_dimension_numbers<[1], [0], [0], [1], [0, 0, 1, 1], [], []>} : vector<8x128xf32>, vector<128x384xf32>, vector<8x384xf32> -> vector<8x384xf32>
    %c0_47 = arith.constant 0 : index
    %c0_48 = arith.constant 0 : index
    %120 = vector.load %arg5[%c0_47, %c0_48] : memref<1x128xf32, #tpu.memory_space<vmem>>, vector<1x128xf32>
    %121 = vector.extract_strided_slice %117 {offsets = [0, 0], sizes = [8, 128], strides = [1, 1]} : vector<8x384xf32> to vector<8x128xf32>
    %122 = vector.broadcast %120 : vector<1x128xf32> to vector<8x128xf32>
    %123 = arith.addf %121, %122 : vector<8x128xf32>
    %cst_49 = arith.constant 5.000000e-01 : f32
    %124 = vector.broadcast %cst_49 : f32 to vector<8x128xf32>
    %125 = arith.mulf %124, %123 : vector<8x128xf32>
    %cst_50 = arith.constant 0.707106769 : f32
    %126 = vector.broadcast %cst_50 : f32 to vector<8x128xf32>
    %127 = arith.mulf %123, %126 : vector<8x128xf32>
    %128 = math.absf %127 : vector<8x128xf32>
    %cst_51 = arith.constant 0.327591091 : f32
    %129 = vector.broadcast %cst_51 : f32 to vector<8x128xf32>
    %130 = arith.mulf %129, %128 : vector<8x128xf32>
    %cst_52 = arith.constant 1.000000e+00 : f32
    %131 = vector.broadcast %cst_52 : f32 to vector<8x128xf32>
    %132 = arith.addf %131, %130 : vector<8x128xf32>
    %cst_53 = arith.constant 1.000000e+00 : f32
    %133 = vector.broadcast %cst_53 : f32 to vector<8x128xf32>
    %134 = arith.divf %133, %132 : vector<8x128xf32>
    %cst_54 = arith.constant 1.06140542 : f32
    %135 = vector.broadcast %cst_54 : f32 to vector<8x128xf32>
    %136 = arith.mulf %134, %135 : vector<8x128xf32>
    %cst_55 = arith.constant -1.45315206 : f32
    %137 = vector.broadcast %cst_55 : f32 to vector<8x128xf32>
    %138 = arith.addf %137, %136 : vector<8x128xf32>
    %139 = arith.mulf %134, %138 : vector<8x128xf32>
    %cst_56 = arith.constant 1.42141378 : f32
    %140 = vector.broadcast %cst_56 : f32 to vector<8x128xf32>
    %141 = arith.addf %140, %139 : vector<8x128xf32>
    %142 = arith.mulf %134, %141 : vector<8x128xf32>
    %cst_57 = arith.constant -0.284496725 : f32
    %143 = vector.broadcast %cst_57 : f32 to vector<8x128xf32>
    %144 = arith.addf %143, %142 : vector<8x128xf32>
    %145 = arith.mulf %134, %144 : vector<8x128xf32>
    %cst_58 = arith.constant 0.254829586 : f32
    %146 = vector.broadcast %cst_58 : f32 to vector<8x128xf32>
    %147 = arith.addf %146, %145 : vector<8x128xf32>
    %148 = arith.mulf %134, %147 : vector<8x128xf32>
    %149 = arith.mulf %128, %128 : vector<8x128xf32>
    %cst_59 = arith.constant 0.000000e+00 : f32
    %150 = vector.broadcast %cst_59 : f32 to vector<8x128xf32>
    %151 = arith.subf %150, %149 : vector<8x128xf32>
    %152 = math.exp %151 : vector<8x128xf32>
    %153 = arith.mulf %148, %152 : vector<8x128xf32>
    %cst_60 = arith.constant 1.000000e+00 : f32
    %154 = vector.broadcast %cst_60 : f32 to vector<8x128xf32>
    %155 = arith.subf %154, %153 : vector<8x128xf32>
    %cst_61 = arith.constant 0.000000e+00 : f32
    %156 = vector.broadcast %cst_61 : f32 to vector<8x128xf32>
    %157 = arith.cmpf olt, %127, %156 : vector<8x128xf32>
    %cst_62 = arith.constant 0.000000e+00 : f32
    %158 = vector.broadcast %cst_62 : f32 to vector<8x128xf32>
    %159 = arith.subf %158, %155 : vector<8x128xf32>
    %160 = arith.select %157, %159, %155 : vector<8x128xi1>, vector<8x128xf32>
    %cst_63 = arith.constant 1.000000e+00 : f32
    %161 = vector.broadcast %cst_63 : f32 to vector<8x128xf32>
    %162 = arith.addf %161, %160 : vector<8x128xf32>
    %163 = arith.mulf %125, %162 : vector<8x128xf32>
    %164 = vector.extract_strided_slice %117 {offsets = [0, 128], sizes = [8, 128], strides = [1, 1]} : vector<8x384xf32> to vector<8x128xf32>
    %165 = vector.extract_strided_slice %119 {offsets = [0, 256], sizes = [8, 128], strides = [1, 1]} : vector<8x384xf32> to vector<8x128xf32>
    %166 = arith.addf %164, %165 : vector<8x128xf32>
    %167 = vector.broadcast %120 : vector<1x128xf32> to vector<8x128xf32>
    %168 = arith.addf %166, %167 : vector<8x128xf32>
    %cst_64 = arith.constant 5.000000e-01 : f32
    %169 = vector.broadcast %cst_64 : f32 to vector<8x128xf32>
    %170 = arith.mulf %169, %168 : vector<8x128xf32>
    %cst_65 = arith.constant 0.707106769 : f32
    %171 = vector.broadcast %cst_65 : f32 to vector<8x128xf32>
    %172 = arith.mulf %168, %171 : vector<8x128xf32>
    %173 = math.absf %172 : vector<8x128xf32>
    %cst_66 = arith.constant 0.327591091 : f32
    %174 = vector.broadcast %cst_66 : f32 to vector<8x128xf32>
    %175 = arith.mulf %174, %173 : vector<8x128xf32>
    %cst_67 = arith.constant 1.000000e+00 : f32
    %176 = vector.broadcast %cst_67 : f32 to vector<8x128xf32>
    %177 = arith.addf %176, %175 : vector<8x128xf32>
    %cst_68 = arith.constant 1.000000e+00 : f32
    %178 = vector.broadcast %cst_68 : f32 to vector<8x128xf32>
    %179 = arith.divf %178, %177 : vector<8x128xf32>
    %cst_69 = arith.constant 1.06140542 : f32
    %180 = vector.broadcast %cst_69 : f32 to vector<8x128xf32>
    %181 = arith.mulf %179, %180 : vector<8x128xf32>
    %cst_70 = arith.constant -1.45315206 : f32
    %182 = vector.broadcast %cst_70 : f32 to vector<8x128xf32>
    %183 = arith.addf %182, %181 : vector<8x128xf32>
    %184 = arith.mulf %179, %183 : vector<8x128xf32>
    %cst_71 = arith.constant 1.42141378 : f32
    %185 = vector.broadcast %cst_71 : f32 to vector<8x128xf32>
    %186 = arith.addf %185, %184 : vector<8x128xf32>
    %187 = arith.mulf %179, %186 : vector<8x128xf32>
    %cst_72 = arith.constant -0.284496725 : f32
    %188 = vector.broadcast %cst_72 : f32 to vector<8x128xf32>
    %189 = arith.addf %188, %187 : vector<8x128xf32>
    %190 = arith.mulf %179, %189 : vector<8x128xf32>
    %cst_73 = arith.constant 0.254829586 : f32
    %191 = vector.broadcast %cst_73 : f32 to vector<8x128xf32>
    %192 = arith.addf %191, %190 : vector<8x128xf32>
    %193 = arith.mulf %179, %192 : vector<8x128xf32>
    %194 = arith.mulf %173, %173 : vector<8x128xf32>
    %cst_74 = arith.constant 0.000000e+00 : f32
    %195 = vector.broadcast %cst_74 : f32 to vector<8x128xf32>
    %196 = arith.subf %195, %194 : vector<8x128xf32>
    %197 = math.exp %196 : vector<8x128xf32>
    %198 = arith.mulf %193, %197 : vector<8x128xf32>
    %cst_75 = arith.constant 1.000000e+00 : f32
    %199 = vector.broadcast %cst_75 : f32 to vector<8x128xf32>
    %200 = arith.subf %199, %198 : vector<8x128xf32>
    %cst_76 = arith.constant 0.000000e+00 : f32
    %201 = vector.broadcast %cst_76 : f32 to vector<8x128xf32>
    %202 = arith.cmpf olt, %172, %201 : vector<8x128xf32>
    %cst_77 = arith.constant 0.000000e+00 : f32
    %203 = vector.broadcast %cst_77 : f32 to vector<8x128xf32>
    %204 = arith.subf %203, %200 : vector<8x128xf32>
    %205 = arith.select %202, %204, %200 : vector<8x128xi1>, vector<8x128xf32>
    %cst_78 = arith.constant 1.000000e+00 : f32
    %206 = vector.broadcast %cst_78 : f32 to vector<8x128xf32>
    %207 = arith.addf %206, %205 : vector<8x128xf32>
    %208 = arith.mulf %170, %207 : vector<8x128xf32>
    %209 = vector.extract_strided_slice %119 {offsets = [0, 0], sizes = [8, 128], strides = [1, 1]} : vector<8x384xf32> to vector<8x128xf32>
    %210 = vector.broadcast %120 : vector<1x128xf32> to vector<8x128xf32>
    %211 = arith.addf %209, %210 : vector<8x128xf32>
    %cst_79 = arith.constant 5.000000e-01 : f32
    %212 = vector.broadcast %cst_79 : f32 to vector<8x128xf32>
    %213 = arith.mulf %212, %211 : vector<8x128xf32>
    %cst_80 = arith.constant 0.707106769 : f32
    %214 = vector.broadcast %cst_80 : f32 to vector<8x128xf32>
    %215 = arith.mulf %211, %214 : vector<8x128xf32>
    %216 = math.absf %215 : vector<8x128xf32>
    %cst_81 = arith.constant 0.327591091 : f32
    %217 = vector.broadcast %cst_81 : f32 to vector<8x128xf32>
    %218 = arith.mulf %217, %216 : vector<8x128xf32>
    %cst_82 = arith.constant 1.000000e+00 : f32
    %219 = vector.broadcast %cst_82 : f32 to vector<8x128xf32>
    %220 = arith.addf %219, %218 : vector<8x128xf32>
    %cst_83 = arith.constant 1.000000e+00 : f32
    %221 = vector.broadcast %cst_83 : f32 to vector<8x128xf32>
    %222 = arith.divf %221, %220 : vector<8x128xf32>
    %cst_84 = arith.constant 1.06140542 : f32
    %223 = vector.broadcast %cst_84 : f32 to vector<8x128xf32>
    %224 = arith.mulf %222, %223 : vector<8x128xf32>
    %cst_85 = arith.constant -1.45315206 : f32
    %225 = vector.broadcast %cst_85 : f32 to vector<8x128xf32>
    %226 = arith.addf %225, %224 : vector<8x128xf32>
    %227 = arith.mulf %222, %226 : vector<8x128xf32>
    %cst_86 = arith.constant 1.42141378 : f32
    %228 = vector.broadcast %cst_86 : f32 to vector<8x128xf32>
    %229 = arith.addf %228, %227 : vector<8x128xf32>
    %230 = arith.mulf %222, %229 : vector<8x128xf32>
    %cst_87 = arith.constant -0.284496725 : f32
    %231 = vector.broadcast %cst_87 : f32 to vector<8x128xf32>
    %232 = arith.addf %231, %230 : vector<8x128xf32>
    %233 = arith.mulf %222, %232 : vector<8x128xf32>
    %cst_88 = arith.constant 0.254829586 : f32
    %234 = vector.broadcast %cst_88 : f32 to vector<8x128xf32>
    %235 = arith.addf %234, %233 : vector<8x128xf32>
    %236 = arith.mulf %222, %235 : vector<8x128xf32>
    %237 = arith.mulf %216, %216 : vector<8x128xf32>
    %cst_89 = arith.constant 0.000000e+00 : f32
    %238 = vector.broadcast %cst_89 : f32 to vector<8x128xf32>
    %239 = arith.subf %238, %237 : vector<8x128xf32>
    %240 = math.exp %239 : vector<8x128xf32>
    %241 = arith.mulf %236, %240 : vector<8x128xf32>
    %cst_90 = arith.constant 1.000000e+00 : f32
    %242 = vector.broadcast %cst_90 : f32 to vector<8x128xf32>
    %243 = arith.subf %242, %241 : vector<8x128xf32>
    %cst_91 = arith.constant 0.000000e+00 : f32
    %244 = vector.broadcast %cst_91 : f32 to vector<8x128xf32>
    %245 = arith.cmpf olt, %215, %244 : vector<8x128xf32>
    %cst_92 = arith.constant 0.000000e+00 : f32
    %246 = vector.broadcast %cst_92 : f32 to vector<8x128xf32>
    %247 = arith.subf %246, %243 : vector<8x128xf32>
    %248 = arith.select %245, %247, %243 : vector<8x128xi1>, vector<8x128xf32>
    %cst_93 = arith.constant 1.000000e+00 : f32
    %249 = vector.broadcast %cst_93 : f32 to vector<8x128xf32>
    %250 = arith.addf %249, %248 : vector<8x128xf32>
    %251 = arith.mulf %213, %250 : vector<8x128xf32>
    %252 = vector.extract_strided_slice %119 {offsets = [0, 128], sizes = [8, 128], strides = [1, 1]} : vector<8x384xf32> to vector<8x128xf32>
    %253 = vector.extract_strided_slice %117 {offsets = [0, 256], sizes = [8, 128], strides = [1, 1]} : vector<8x384xf32> to vector<8x128xf32>
    %c7_i32_94 = arith.constant 7 : i32
    %254 = tpu.dynamic_rotate %253 by %c7_i32_94 dim 0 : vector<8x128xf32>, i32 -> vector<8x128xf32>
    %cst_95 = arith.constant 0.000000e+00 : f32
    %255 = vector.broadcast %cst_95 : f32 to vector<8x128xf32>
    %256 = arith.select %19, %254, %255 : vector<8x128xi1>, vector<8x128xf32>
    %257 = arith.addf %252, %256 : vector<8x128xf32>
    %258 = vector.broadcast %120 : vector<1x128xf32> to vector<8x128xf32>
    %259 = arith.addf %257, %258 : vector<8x128xf32>
    %cst_96 = arith.constant 5.000000e-01 : f32
    %260 = vector.broadcast %cst_96 : f32 to vector<8x128xf32>
    %261 = arith.mulf %260, %259 : vector<8x128xf32>
    %cst_97 = arith.constant 0.707106769 : f32
    %262 = vector.broadcast %cst_97 : f32 to vector<8x128xf32>
    %263 = arith.mulf %259, %262 : vector<8x128xf32>
    %264 = math.absf %263 : vector<8x128xf32>
    %cst_98 = arith.constant 0.327591091 : f32
    %265 = vector.broadcast %cst_98 : f32 to vector<8x128xf32>
    %266 = arith.mulf %265, %264 : vector<8x128xf32>
    %cst_99 = arith.constant 1.000000e+00 : f32
    %267 = vector.broadcast %cst_99 : f32 to vector<8x128xf32>
    %268 = arith.addf %267, %266 : vector<8x128xf32>
    %cst_100 = arith.constant 1.000000e+00 : f32
    %269 = vector.broadcast %cst_100 : f32 to vector<8x128xf32>
    %270 = arith.divf %269, %268 : vector<8x128xf32>
    %cst_101 = arith.constant 1.06140542 : f32
    %271 = vector.broadcast %cst_101 : f32 to vector<8x128xf32>
    %272 = arith.mulf %270, %271 : vector<8x128xf32>
    %cst_102 = arith.constant -1.45315206 : f32
    %273 = vector.broadcast %cst_102 : f32 to vector<8x128xf32>
    %274 = arith.addf %273, %272 : vector<8x128xf32>
    %275 = arith.mulf %270, %274 : vector<8x128xf32>
    %cst_103 = arith.constant 1.42141378 : f32
    %276 = vector.broadcast %cst_103 : f32 to vector<8x128xf32>
    %277 = arith.addf %276, %275 : vector<8x128xf32>
    %278 = arith.mulf %270, %277 : vector<8x128xf32>
    %cst_104 = arith.constant -0.284496725 : f32
    %279 = vector.broadcast %cst_104 : f32 to vector<8x128xf32>
    %280 = arith.addf %279, %278 : vector<8x128xf32>
    %281 = arith.mulf %270, %280 : vector<8x128xf32>
    %cst_105 = arith.constant 0.254829586 : f32
    %282 = vector.broadcast %cst_105 : f32 to vector<8x128xf32>
    %283 = arith.addf %282, %281 : vector<8x128xf32>
    %284 = arith.mulf %270, %283 : vector<8x128xf32>
    %285 = arith.mulf %264, %264 : vector<8x128xf32>
    %cst_106 = arith.constant 0.000000e+00 : f32
    %286 = vector.broadcast %cst_106 : f32 to vector<8x128xf32>
    %287 = arith.subf %286, %285 : vector<8x128xf32>
    %288 = math.exp %287 : vector<8x128xf32>
    %289 = arith.mulf %284, %288 : vector<8x128xf32>
    %cst_107 = arith.constant 1.000000e+00 : f32
    %290 = vector.broadcast %cst_107 : f32 to vector<8x128xf32>
    %291 = arith.subf %290, %289 : vector<8x128xf32>
    %cst_108 = arith.constant 0.000000e+00 : f32
    %292 = vector.broadcast %cst_108 : f32 to vector<8x128xf32>
    %293 = arith.cmpf olt, %263, %292 : vector<8x128xf32>
    %cst_109 = arith.constant 0.000000e+00 : f32
    %294 = vector.broadcast %cst_109 : f32 to vector<8x128xf32>
    %295 = arith.subf %294, %291 : vector<8x128xf32>
    %296 = arith.select %293, %295, %291 : vector<8x128xi1>, vector<8x128xf32>
    %cst_110 = arith.constant 1.000000e+00 : f32
    %297 = vector.broadcast %cst_110 : f32 to vector<8x128xf32>
    %298 = arith.addf %297, %296 : vector<8x128xf32>
    %299 = arith.mulf %261, %298 : vector<8x128xf32>
    %c0_111 = arith.constant 0 : index
    %c0_112 = arith.constant 0 : index
    %300 = vector.load %arg6[%c0_111, %c0_112] : memref<128x384xf32, #tpu.memory_space<vmem>>, vector<128x384xf32>
    %cst_113 = arith.constant dense<0.000000e+00> : vector<8x384xf32>
    %301 = tpu.matmul %163, %300, %cst_113 {dimension_numbers = #tpu.dot_dimension_numbers<[1], [0], [0], [1], [0, 0, 1, 1], [], []>} : vector<8x128xf32>, vector<128x384xf32>, vector<8x384xf32> -> vector<8x384xf32>
    %c0_114 = arith.constant 0 : index
    %c0_115 = arith.constant 0 : index
    %302 = vector.load %arg6[%c0_114, %c0_115] : memref<128x384xf32, #tpu.memory_space<vmem>>, vector<128x384xf32>
    %cst_116 = arith.constant dense<0.000000e+00> : vector<8x384xf32>
    %303 = tpu.matmul %208, %302, %cst_116 {dimension_numbers = #tpu.dot_dimension_numbers<[1], [0], [0], [1], [0, 0, 1, 1], [], []>} : vector<8x128xf32>, vector<128x384xf32>, vector<8x384xf32> -> vector<8x384xf32>
    %c0_117 = arith.constant 0 : index
    %c0_118 = arith.constant 0 : index
    %304 = vector.load %arg6[%c0_117, %c0_118] : memref<128x384xf32, #tpu.memory_space<vmem>>, vector<128x384xf32>
    %cst_119 = arith.constant dense<0.000000e+00> : vector<8x384xf32>
    %305 = tpu.matmul %251, %304, %cst_119 {dimension_numbers = #tpu.dot_dimension_numbers<[1], [0], [0], [1], [0, 0, 1, 1], [], []>} : vector<8x128xf32>, vector<128x384xf32>, vector<8x384xf32> -> vector<8x384xf32>
    %c0_120 = arith.constant 0 : index
    %c0_121 = arith.constant 0 : index
    %306 = vector.load %arg6[%c0_120, %c0_121] : memref<128x384xf32, #tpu.memory_space<vmem>>, vector<128x384xf32>
    %cst_122 = arith.constant dense<0.000000e+00> : vector<8x384xf32>
    %307 = tpu.matmul %299, %306, %cst_122 {dimension_numbers = #tpu.dot_dimension_numbers<[1], [0], [0], [1], [0, 0, 1, 1], [], []>} : vector<8x128xf32>, vector<128x384xf32>, vector<8x384xf32> -> vector<8x384xf32>
    %308 = vector.extract_strided_slice %307 {offsets = [0, 0], sizes = [8, 128], strides = [1, 1]} : vector<8x384xf32> to vector<8x128xf32>
    %c1_i32_123 = arith.constant 1 : i32
    %309 = tpu.dynamic_rotate %308 by %c1_i32_123 dim 0 : vector<8x128xf32>, i32 -> vector<8x128xf32>
    %cst_124 = arith.constant 0.000000e+00 : f32
    %310 = vector.broadcast %cst_124 : f32 to vector<8x128xf32>
    %311 = arith.select %21, %309, %310 : vector<8x128xi1>, vector<8x128xf32>
    %312 = vector.extract_strided_slice %301 {offsets = [0, 128], sizes = [8, 128], strides = [1, 1]} : vector<8x384xf32> to vector<8x128xf32>
    %313 = arith.addf %311, %312 : vector<8x128xf32>
    %314 = vector.extract_strided_slice %303 {offsets = [0, 256], sizes = [8, 128], strides = [1, 1]} : vector<8x384xf32> to vector<8x128xf32>
    %315 = arith.addf %313, %314 : vector<8x128xf32>
    %316 = vector.extract_strided_slice %301 {offsets = [0, 0], sizes = [8, 128], strides = [1, 1]} : vector<8x384xf32> to vector<8x128xf32>
    %317 = vector.extract_strided_slice %303 {offsets = [0, 128], sizes = [8, 128], strides = [1, 1]} : vector<8x384xf32> to vector<8x128xf32>
    %318 = arith.addf %316, %317 : vector<8x128xf32>
    %319 = vector.extract_strided_slice %305 {offsets = [0, 256], sizes = [8, 128], strides = [1, 1]} : vector<8x384xf32> to vector<8x128xf32>
    %320 = arith.addf %318, %319 : vector<8x128xf32>
    %321 = vector.extract_strided_slice %303 {offsets = [0, 0], sizes = [8, 128], strides = [1, 1]} : vector<8x384xf32> to vector<8x128xf32>
    %322 = vector.extract_strided_slice %305 {offsets = [0, 128], sizes = [8, 128], strides = [1, 1]} : vector<8x384xf32> to vector<8x128xf32>
    %323 = arith.addf %321, %322 : vector<8x128xf32>
    %324 = vector.extract_strided_slice %307 {offsets = [0, 256], sizes = [8, 128], strides = [1, 1]} : vector<8x384xf32> to vector<8x128xf32>
    %325 = arith.addf %323, %324 : vector<8x128xf32>
    %326 = vector.extract_strided_slice %305 {offsets = [0, 0], sizes = [8, 128], strides = [1, 1]} : vector<8x384xf32> to vector<8x128xf32>
    %327 = vector.extract_strided_slice %307 {offsets = [0, 128], sizes = [8, 128], strides = [1, 1]} : vector<8x384xf32> to vector<8x128xf32>
    %328 = arith.addf %326, %327 : vector<8x128xf32>
    %329 = vector.extract_strided_slice %301 {offsets = [0, 256], sizes = [8, 128], strides = [1, 1]} : vector<8x384xf32> to vector<8x128xf32>
    %c7_i32_125 = arith.constant 7 : i32
    %330 = tpu.dynamic_rotate %329 by %c7_i32_125 dim 0 : vector<8x128xf32>, i32 -> vector<8x128xf32>
    %cst_126 = arith.constant 0.000000e+00 : f32
    %331 = vector.broadcast %cst_126 : f32 to vector<8x128xf32>
    %332 = arith.select %19, %330, %331 : vector<8x128xi1>, vector<8x128xf32>
    %333 = arith.addf %328, %332 : vector<8x128xf32>
    %334 = tpu.concatenate %315, %320, %325, %333 in 1 : vector<8x128xf32>, vector<8x128xf32>, vector<8x128xf32>, vector<8x128xf32> -> vector<8x512xf32>
    %c0_127 = arith.constant 0 : index
    %c0_128 = arith.constant 0 : index
    %335 = vector.load %arg7[%c0_127, %c0_128] : memref<1x512xf32, #tpu.memory_space<vmem>>, vector<1x512xf32>
    %336 = vector.broadcast %335 : vector<1x512xf32> to vector<8x512xf32>
    %337 = arith.addf %334, %336 : vector<8x512xf32>
    %c0_129 = arith.constant 0 : index
    %c0_130 = arith.constant 0 : index
    %338 = vector.load %arg8[%c0_129, %c0_130] : memref<8x512xf32, #tpu.memory_space<vmem>>, vector<8x512xf32>
    tpu.vector_store %arg8[%c0_129, %c0_130], %337 {strides = array<i32>} : memref<8x512xf32, #tpu.memory_space<vmem>>, vector<8x512xf32>,
    return
  }
  func.func @transform_0(%arg0: i32) -> (i32, i32) {
    %c0_i32 = arith.constant 0 : i32
    %c0_i32_0 = arith.constant 0 : i32
    return %arg0, %c0_i32 : i32, i32
  }
  func.func @transform_1(%arg0: i32) -> (i32, i32) {
    %c0_i32 = arith.constant 0 : i32
    %c0_i32_0 = arith.constant 0 : i32
    %c0_i32_1 = arith.constant 0 : i32
    return %c0_i32, %c0_i32_0 : i32, i32
  }
  func.func @transform_2(%arg0: i32) -> (i32, i32) {
    %c0_i32 = arith.constant 0 : i32
    %c0_i32_0 = arith.constant 0 : i32
    %c0_i32_1 = arith.constant 0 : i32
    return %c0_i32, %c0_i32_0 : i32, i32
  }
  func.func @transform_3(%arg0: i32) -> (i32, i32) {
    %c0_i32 = arith.constant 0 : i32
    %c0_i32_0 = arith.constant 0 : i32
    %c0_i32_1 = arith.constant 0 : i32
    return %c0_i32, %c0_i32_0 : i32, i32
  }
  func.func @transform_4(%arg0: i32) -> (i32, i32) {
    %c0_i32 = arith.constant 0 : i32
    %c0_i32_0 = arith.constant 0 : i32
    %c0_i32_1 = arith.constant 0 : i32
    return %c0_i32, %c0_i32_0 : i32, i32
  }
  func.func @transform_5(%arg0: i32) -> (i32, i32) {
    %c0_i32 = arith.constant 0 : i32
    %c0_i32_0 = arith.constant 0 : i32
    %c0_i32_1 = arith.constant 0 : i32
    return %c0_i32, %c0_i32_0 : i32, i32
  }
  func.func @transform_6(%arg0: i32) -> (i32, i32) {
    %c0_i32 = arith.constant 0 : i32
    %c0_i32_0 = arith.constant 0 : i32
    %c0_i32_1 = arith.constant 0 : i32
    return %c0_i32, %c0_i32_0 : i32, i32
  }
  func.func @transform_7(%arg0: i32) -> (i32, i32) {
    %c0_i32 = arith.constant 0 : i32
    %c0_i32_0 = arith.constant 0 : i32
    return %arg0, %c0_i32 : i32, i32
  }
}

</mosaic_0001>

<bundles_post_ra>
// kernel: tpu_custom_call.1
= control target key start
LH: loop header
LB: loop body
LE: loop exit
PB: predicated region body
PF: predicated region fallthrough
CT: control target
= control target key end

     0   :  { %12 = vsyncpa [#allocation3], 0  ;;  %s3881_s0 = inlined_call_operand.hbm [shape: f32[16,128], index: 0, kind: input, shape index: {}]   ;;  %s3882_s1 = inlined_call_operand.hbm [shape: f32[128,384], index: 1, kind: input, shape index: {}]   ;;  %s3883_s2 = inlined_call_operand.hbm [shape: f32[1,128], index: 2, kind: input, shape index: {}]   ;;  %s3884_s3 = inlined_call_operand.hbm [shape: f32[128,384], index: 3, kind: input, shape index: {}]   ;;  %s3885_s4 = inlined_call_operand.hbm [shape: f32[1,128], index: 4, kind: input, shape index: {}]   ;;  %s3886_s5 = inlined_call_operand.hbm [shape: f32[128,384], index: 5, kind: input, shape index: {}]   ;;  %s3887_s6 = inlined_call_operand.hbm [shape: f32[1,512], index: 6, kind: input, shape index: {}]   ;;  %s3888_s7 = inlined_call_operand.hbm [shape: f32[16,512], index: 7, kind: output, shape index: {}]  }
   0x1   :  { %14 = vsyncpa [#allocation3 + $0x1], 0 }
   0x2   :  { %15 = vsyncpa [#allocation6], 0 }
   0x3   :  { %16 = vsyncpa [#allocation9], 0 }
   0x4   :  { %17 = vsyncpa [#allocation12], 0 }
   0x5   :  { %18 = vsyncpa [#allocation4], 0 }
   0x6   :  { %20 = vsyncpa [#allocation4 + $0x1], 0  ;;  %s3147_s24 = smov 0   ;;  %s3149_s25 = smov 0  }
   0x7   :  { %s3151_s26 = smov 0   ;;  %s3153_s27 = smov 0  }
   0x8 LB: > { %s3094_s28 = smov [#allocation5]   ;;  %s3168_s30 = sadd.s32 4294967295, %s3092_s27   ;;  %s3092_s27 = sphi %s3153_s27, %s3916_s27   ;;  %s3088_s26 = sphi %s3151_s26, %s3915_s26   ;;  %s3084_s25 = sphi %s3149_s25, %s3914_s25   ;;  %s3080_s24 = sphi %s3147_s24, %s3913_s24  }
   0x9   : > { %s221_s29 = sshll.u32 %s3094_s28, 4  ;;  %p1897_p0 = scmp.ge.s32.totalorder %s3092_s27, 1  ;;  %s3173_s29 = int_to_ptr.vmem [resolvable:$true] %s221_s29 }
   0xa   : > { %p3889_p1 = scmp.eq.s32.totalorder %s3168_s30, 0  ;;  %p209_p2 = scmp.lt.s32.totalorder %s3092_s27, 3 }
   0xb   : > { %s3095_s9 = smov [#allocation8]   ;;  %s3096_s12 = smov [#allocation11]  }
   0xc   : > { %p3175_p3 = pnand %p1897_p0, %p209_p2  ;;  %s245_s10 = sshll.u32 %s3095_s9, 4  ;;  %s3188_s10 = int_to_ptr.vmem [resolvable:$true] %s245_s10 }
   0xd   : > { %s269_s13 = sshll.u32 %s3096_s12, 4  ;;  %s2816_s16 = scalar_lea.hbm %s3882_s1, 6144  ;;  %s3190_s13 = int_to_ptr.vmem [resolvable:$true] %s269_s13 }
   0xe   : > { %s3892_s8 = scalar_select %p3175_p3, 1, 0 }
   0xf   : > { %p2708_p5 = pneg %p3175_p3  ;;  %p2817_p7 = scmp.ne.s32.totalorder %s3882_s1, %s2816_s16 }
  0x10   : > { %p2823_p11 = scmp.lt.u32.totalorder %s2816_s16, %s3882_s1 }
  0x11   : > { %p3184_p6 = pnand %p2708_p5, %p3889_p1 }
  0x13   : > { %p3200_p8 = pneg %p3184_p6 }
  0x15   : > { %p2819_p9 = pnand %p3200_p8, %p2817_p7 }
  0x17   : > { %p2820_p10 = pneg %p2819_p9 }
  0x19   : > { %p2825_p12 = pnand %p2823_p11, %p2820_p10 }
  0x1b   : > { %2828 = shalt.err (!%p2825_p12)
}
  0x1c   : > { %s2829_s22 = scalar_lea.vmem %s3173_s29, 6144  ;;  %p2837_p5 = scmp.lt.s32.totalorder %s3173_s29, %s3173_s29 }
  0x1d   : > { %p2830_p13 = scmp.ne.s32.totalorder %s3173_s29, %s2829_s22  ;;  %p2838_p4 = scmp.lt.s32.totalorder %s2829_s22, %s2829_s22 }
  0x1f   : > { %p2832_p0 = pnand %p2830_p13, %p3200_p8  ;;  %p2839_p7 = por %p2838_p4, %p2837_p5 }
  0x21   : > { %p2833_p2 = pneg %p2832_p0 }
  0x23   : > { %p2840_p9 = pnand %p2839_p7, %p2833_p2 }
  0x25   : > { %2843 = shalt.err (!%p2840_p9)
}
  0x26   : > { %s3097_s23 = smov 384   ;;  %s3098_s28 = smov 24  }
  0x27   : > { %2711 = dma.hbm_to_vmem [thread:$0]  (!%p3184_p6), %s3882_s1, 6144, %s3173_s29, [#allocation6], %s3097_s23, %s3097_s23, %s3098_s28  }
  0x28   : > { %s2844_s16 = scalar_lea.hbm %s3884_s3, 6144 }
  0x29   : > { %p2845_p4 = scmp.ne.s32.totalorder %s3884_s3, %s2844_s16  ;;  %p2851_p12 = scmp.lt.u32.totalorder %s2844_s16, %s3884_s3 }
  0x2b   : > { %p2847_p10 = pnand %p2845_p4, %p3200_p8 }
  0x2d   : > { %p2848_p11 = pneg %p2847_p10 }
  0x2f   : > { %p2853_p13 = pnand %p2851_p12, %p2848_p11 }
  0x31   : > { %2856 = shalt.err (!%p2853_p13)
}
  0x32   : > { %s2857_s29 = scalar_lea.vmem %s3188_s10, 6144  ;;  %p2865_p7 = scmp.lt.s32.totalorder %s3188_s10, %s3188_s10 }
  0x33   : > { %p2858_p0 = scmp.ne.s32.totalorder %s3188_s10, %s2857_s29  ;;  %p2866_p9 = scmp.lt.s32.totalorder %s2857_s29, %s2857_s29 }
  0x35   : > { %p2860_p2 = pnand %p2858_p0, %p3200_p8  ;;  %p2867_p4 = por %p2866_p9, %p2865_p7 }
  0x37   : > { %p2861_p5 = pneg %p2860_p2 }
  0x39   : > { %p2868_p10 = pnand %p2867_p4, %p2861_p5 }
  0x3b   : > { %2871 = shalt.err (!%p2868_p10)
}
  0x3c   : > { %2717 = dma.hbm_to_vmem [thread:$0]  (!%p3184_p6), %s3884_s3, 6144, %s3188_s10, [#allocation9], %s3097_s23, %s3097_s23, %s3098_s28  }
  0x3d   : > { %s2872_s15 = scalar_lea.hbm %s3886_s5, 6144 }
  0x3e   : > { %p2873_p11 = scmp.ne.s32.totalorder %s3886_s5, %s2872_s15  ;;  %p2879_p0 = scmp.lt.u32.totalorder %s2872_s15, %s3886_s5 }
  0x40   : > { %p2875_p12 = pnand %p2873_p11, %p3200_p8 }
  0x42   : > { %p2876_p13 = pneg %p2875_p12 }
  0x44   : > { %p2881_p2 = pnand %p2879_p0, %p2876_p13 }
  0x46   : > { %2884 = shalt.err (!%p2881_p2)
}
  0x47   : > { %s2885_s10 = scalar_lea.vmem %s3190_s13, 6144  ;;  %p2893_p4 = scmp.lt.s32.totalorder %s3190_s13, %s3190_s13 }
  0x48   : > { %p2886_p5 = scmp.ne.s32.totalorder %s3190_s13, %s2885_s10  ;;  %p2894_p10 = scmp.lt.s32.totalorder %s2885_s10, %s2885_s10 }
  0x4a   : > { %p2888_p7 = pnand %p2886_p5, %p3200_p8  ;;  %p2895_p11 = por %p2894_p10, %p2893_p4 }
  0x4c   : > { %p2889_p9 = pneg %p2888_p7 }
  0x4e   : > { %p2896_p12 = pnand %p2895_p11, %p2889_p9 }
  0x50   : > { %2899 = shalt.err (!%p2896_p12)
}
  0x51   : > { %2723 = dma.hbm_to_vmem [thread:$0]  (!%p3184_p6), %s3886_s5, 6144, %s3190_s13, [#allocation12], %s3097_s23, %s3097_s23, %s3098_s28  }
  0x52   : > { %s3099_s22 = smov [#allocation7]   ;;  %s3100_s12 = smov [#allocation10]  }
  0x53   : > { %s235_s9 = sshll.u32 %s3099_s22, 4  ;;  %s259_s14 = sshll.u32 %s3100_s12, 4  ;;  %s236_s9 = int_to_ptr.vmem [resolvable:$true] %s235_s9  ;;  %s260_s14 = int_to_ptr.vmem [resolvable:$true] %s259_s14 }
  0x54   : > { %s2900_s17 = scalar_lea.hbm %s3883_s2, 16 }
  0x55   : > { %p2901_p13 = scmp.ne.s32.totalorder %s3883_s2, %s2900_s17  ;;  %p2907_p5 = scmp.lt.u32.totalorder %s2900_s17, %s3883_s2 }
  0x57   : > { %p2903_p0 = pnand %p2901_p13, %p3200_p8 }
  0x59   : > { %p2904_p2 = pneg %p2903_p0 }
  0x5b   : > { %p2909_p7 = pnand %p2907_p5, %p2904_p2 }
  0x5d   : > { %2912 = shalt.err (!%p2909_p7)
}
  0x5e   : > { %s2913_s13 = scalar_lea.vmem %s236_s9, 16  ;;  %s2920_s23 = scalar_lea.vmem %s236_s9, 32 }
  0x5f   : > { %p2914_p9 = scmp.ne.s32.totalorder %s236_s9, %s2913_s13  ;;  %p2921_p11 = scmp.lt.s32.totalorder %s236_s9, %s236_s9 }
  0x60   : > { %p2922_p12 = scmp.lt.s32.totalorder %s2920_s23, %s2913_s13 }
  0x61   : > { %p2916_p4 = pnand %p2914_p9, %p3200_p8 }
  0x62   : > { %p2923_p1 = por %p2922_p12, %p2921_p11 }
  0x63   : > { %p2917_p10 = pneg %p2916_p4 }
  0x65   : > { %p2924_p3 = pnand %p2923_p1, %p2917_p10 }
  0x67   : > { %2927 = shalt.err (!%p2924_p3)
}
  0x68   : > { %2714 = dma.hbm_to_vmem [thread:$0]  (!%p3184_p6), %s3883_s2, 16, %s236_s9, [#allocation6]  }
  0x69   : > { %s2928_s15 = scalar_lea.hbm %s3885_s4, 16 }
  0x6a   : > { %p2929_p13 = scmp.ne.s32.totalorder %s3885_s4, %s2928_s15  ;;  %p2935_p3 = scmp.lt.u32.totalorder %s2928_s15, %s3885_s4 }
  0x6c   : > { %p2931_p0 = pnand %p2929_p13, %p3200_p8 }
  0x6e   : > { %p2932_p1 = pneg %p2931_p0 }
  0x70   : > { %p2937_p2 = pnand %p2935_p3, %p2932_p1 }
  0x72   : > { %2940 = shalt.err (!%p2937_p2)
}
  0x73   : > { %s2941_s10 = scalar_lea.vmem %s260_s14, 16  ;;  %s2948_s9 = scalar_lea.vmem %s260_s14, 32 }
  0x74   : > { %p2942_p5 = scmp.ne.s32.totalorder %s260_s14, %s2941_s10  ;;  %p2949_p4 = scmp.lt.s32.totalorder %s260_s14, %s260_s14 }
  0x75   : > { %p2950_p10 = scmp.lt.s32.totalorder %s2948_s9, %s2941_s10 }
  0x76   : > { %p2944_p7 = pnand %p2942_p5, %p3200_p8 }
  0x77   : > { %p2951_p11 = por %p2950_p10, %p2949_p4 }
  0x78   : > { %p2945_p9 = pneg %p2944_p7 }
  0x7a   : > { %p2952_p12 = pnand %p2951_p11, %p2945_p9 }
  0x7c   : > { %2955 = shalt.err (!%p2952_p12)
}
  0x7d   : > { %2720 = dma.hbm_to_vmem [thread:$0]  (!%p3184_p6), %s3885_s4, 16, %s260_s14, [#allocation9]  }
  0x7e   : > { %s3101_s23 = smov [#allocation13]   ;;  %s2956_s12 = scalar_lea.hbm %s3887_s6, 64 }
  0x7f   : > { %s283_s28 = sshll.u32 %s3101_s23, 4  ;;  %p2957_p13 = scmp.ne.s32.totalorder %s3887_s6, %s2956_s12  ;;  %s284_s28 = int_to_ptr.vmem [resolvable:$true] %s283_s28 }
  0x80   : > { %p2963_p3 = scmp.lt.u32.totalorder %s2956_s12, %s3887_s6 }
  0x81   : > { %p2959_p0 = pnand %p2957_p13, %p3200_p8 }
  0x83   : > { %p2960_p1 = pneg %p2959_p0 }
  0x85   : > { %p2965_p2 = pnand %p2963_p3, %p2960_p1 }
  0x87   : > { %2968 = shalt.err (!%p2965_p2)
}
  0x88   : > { %s2969_s14 = scalar_lea.vmem %s284_s28, 64  ;;  %p2977_p4 = scmp.lt.s32.totalorder %s284_s28, %s284_s28 }
  0x89   : > { %p2970_p5 = scmp.ne.s32.totalorder %s284_s28, %s2969_s14  ;;  %p2978_p10 = scmp.lt.s32.totalorder %s2969_s14, %s2969_s14 }
  0x8b   : > { %p2972_p7 = pnand %p2970_p5, %p3200_p8  ;;  %p2979_p11 = por %p2978_p10, %p2977_p4 }
  0x8d   : > { %p2973_p9 = pneg %p2972_p7 }
  0x8f   : > { %p2980_p12 = pnand %p2979_p11, %p2973_p9 }
  0x91   : > { %2983 = shalt.err (!%p2980_p12)
}
  0x92   : > { %2726 = dma.hbm_to_vmem [thread:$0]  (!%p3184_p6), %s3887_s6, 64, %s284_s28, [#allocation12]  }
  0x93   : > { %s1896_s19 = sadd.s32 4294967294, %s3092_s27   ;;  %s3332_s11 = sadd.s32 1, %s3092_s27  }
  0x94   : > { %s30_s9 = ssub.s32 %s3092_s27, %s3332_s11  ;;  %s33_s21 = sadd.s32 1, %s3088_s26 }
  0x95   : > { %p31_p8 = scmp.eq.s32.totalorder %s30_s9, 0  ;;  %p40_p13 = scmp.ne.s32.totalorder %s3088_s26, %s3084_s25 }
  0x96   : > { %p41_p0 = scmp.eq.s32.totalorder %s3092_s27, 0  ;;  %p46_p1 = scmp.ne.s32.totalorder %s3084_s25, %s3080_s24 }
  0x97   : > { %s3343_s13 = scalar_select %p31_p8, %s3088_s26, %s33_s21  }
  0x98   : > { %p3345_p3 = por %p41_p0, %p40_p13  ;;  %p3896_p2 = scmp.eq.s32.totalorder %s3168_s30, 0 }
  0x99   : > { %p196_p5 = scmp.eq.s32.totalorder %s3168_s30, 1  ;;  %p202_p7 = scmp.eq.s32.totalorder %s1896_s19, 1 }
  0x9a   : > { %p3351_p6 = por %p3896_p2, %p46_p1  ;;  %p2741_p9 = scmp.lt.s32.totalorder %s3092_s27, 2 }
  0x9b   : > { %s294_s29 = sand.u32 1, %s3088_s26   ;;  %p3358_p4 = por %p196_p5, %p40_p13 }
  0x9c   : > { %p3362_p10 = por %p202_p7, %p46_p1  ;;  %s1905_s15 = sshll.u32 %s294_s29, 3 }
  0x9d   : > { %s3898_s22 = scalar_select %p3358_p4, 1, 0 }
  0x9e   : > { %s3899_s12 = scalar_select %p3362_p10, 1, 0 }
  0x9f   : > { %s1906_s16 = sshll.u32 %s3092_s27, 7  ;;  %s298_s20 = scalar_lea.vmem [#allocation2], %s1905_s15 }
  0xa0   : > { %s3370_s14 = scalar_lea.hbm %s3881_s0, %s1906_s16  ;;  %s305_s10 = sshll.u32 %s298_s20, 4  ;;  %s3372_s10 = int_to_ptr.vmem [resolvable:$true] %s305_s10 }
  0xa1   : > { %p3376_p11 = pnand %p2741_p9, %p3345_p3  ;;  %s295_s9 = scalar_lea.sflag [#allocation3], %s294_s29 }
  0xa2   : > { %s2984_s21 = scalar_lea.hbm %s3370_s14, 128  ;;  %s2989_s17 = scalar_lea.hbm %s3881_s0, 256 }
  0xa3   : > { %p2985_p12 = scmp.ne.s32.totalorder %s3370_s14, %s2984_s21  ;;  %p2986_p8 = pneg %p3376_p11 }
  0xa4   : > { %p2990_p1 = scmp.lt.u32.totalorder %s3370_s14, %s3881_s0  ;;  %p2991_p3 = scmp.lt.u32.totalorder %s2989_s17, %s2984_s21 }
  0xa5   : > { %p2987_p13 = pnand %p2986_p8, %p2985_p12  ;;  %p2993_p5 = scmp.lt.u32.totalorder %s2984_s21, %s3370_s14 }
  0xa6   : > { %p2992_p2 = por %p2991_p3, %p2990_p1 }
  0xa7   : > { %p2988_p0 = pneg %p2987_p13 }
  0xa8   : > { %p2994_p7 = por %p2993_p5, %p2992_p2 }
  0xaa   : > { %p2995_p9 = pnand %p2994_p7, %p2988_p0 }
  0xac   : > { %2998 = shalt.err (!%p2995_p9)
}
  0xad   : > { %s2999_s29 = scalar_lea.vmem %s3372_s10, 128  ;;  %s3102_s20 = smov [#allocation2]  }
  0xae   : > { %p3000_p12 = scmp.ne.s32.totalorder %s3372_s10, %s2999_s29  ;;  %s3004_s15 = sshll.u32 %s3102_s20, 4  ;;  %s3005_s15 = int_to_ptr.vmem [resolvable:$false] %s3004_s15 }
  0xaf   : > { %s3006_s16 = scalar_lea.vmem %s3005_s15, 256  ;;  %p3007_p4 = scmp.lt.s32.totalorder %s3372_s10, %s3005_s15 }
  0xb0   : > { %p3002_p13 = pnand %p3000_p12, %p2986_p8  ;;  %p3008_p1 = scmp.lt.s32.totalorder %s3006_s16, %s2999_s29 }
  0xb2   : > { %p3003_p10 = pneg %p3002_p13  ;;  %p3009_p3 = por %p3008_p1, %p3007_p4 }
  0xb4   : > { %p3010_p2 = pnand %p3009_p3, %p3003_p10 }
  0xb6   : > { %3013 = shalt.err (!%p3010_p2)
}
  0xb7   : > { %2730 = dma.hbm_to_vmem [thread:$0]  (!%p3376_p11), %s3370_s14, 128, %s3372_s10, %s295_s9  }
  0xb8   : > { %p3901_p0 = scmp.ne.s32.totalorder %s3892_s8, 0 }
  0xb9   : > { %s3408_s21 = sand.u32 (!%p3901_p0), 1, %s3084_s25  }
  0xba   : > { %314 = sbr.rel (%p3901_p0) target bundleno = 1096 (0x448), region = 48  ;;  %s1908_s17 = sshll.u32 (!%p3901_p0), %s3408_s21, 3 }
  0xbb   : > { %s317_s23 = scalar_lea.sflag (!%p3901_p0), [#allocation3], %s3408_s21  ;;  %s3412_s18 = scalar_lea.vmem (!%p3901_p0), [#allocation2], %s1908_s17 }
  0xc1   : > { %3059 = dma.done.wait (%p3351_p6), %s317_s23, 128  }
  0xc2   : > { %3061 = vsyncadd (%p3351_p6), %s317_s23, 4294967168  ;;  %p3902_p4 = scmp.eq.s32.totalorder %s3168_s30, 0 }
  0xc4   : > { %3063 = dma.done.wait (%p3902_p4), [#allocation6], 6160   ;;  %p3903_p10 = pmov %p3902_p4 }
  0xc5   : > { %p3904_p11 = pmov %p3902_p4 }
  0xc6   : > { %3065 = vsyncadd (%p3903_p10), [#allocation6], 4294961136 }
  0xc7   : > { %3067 = dma.done.wait (%p3904_p11), [#allocation9], 6160   ;;  %p3905_p8 = pmov %p3902_p4 }
  0xc8   : > { %p3906_p5 = pmov %p3902_p4 }
  0xc9   : > { %3069 = vsyncadd (%p3905_p8), [#allocation9], 4294961136 }
  0xca   : > { %3071 = dma.done.wait (%p3906_p5), [#allocation12], 6208   ;;  %p3907_p7 = pmov %p3902_p4 }
  0xcb   : > { %v3103_v0 = vmov 0.0|0.0   ;;  %vm3104_vm0 = vmmov 0   ;;  %v3105_v1 = vmov 0.0   ;;  %v393_v2 = vld [vmem:[#allocation5 + $0x8] sm:$0xff]  ;;  %v396_v3 = vld [vmem:[#allocation5 + $0x20] sm:$0xff]  ;;  %v394_v4 = vld [vmem:[#allocation5 + $0x10] sm:$0xff] }
  0xcc   : > { %3073 = vsyncadd (%p3907_p7), [#allocation12], 4294961088  ;;  %2320 = vmatprep.subr.bf16.mxu1 %v3103_v0  ;;  %2075 = vmatprep.mubr.msk.f32.mxu1 %vm3104_vm0, %v3105_v1  ;;  %v2288_v5 = vpack.c.bf16 %v396_v3, %v393_v2  ;;  %v397_v6 = vld [vmem:[#allocation5 + $0x28] sm:$0xff]  ;;  %v392_v7 = vld [vmem:[#allocation5] sm:$0xff]  ;;  %s1915_s8 = sshll.u32 %s3408_s21, 5  ;;  %s1923_s14 = sshll.u32 %s3168_s30, 9 }
  0xcd   : > { %504 = vmatprep.mubr.f32.mxu0 %v3105_v1  ;;  %v395_v8 = vld [vmem:[#allocation5 + $0x18] sm:$0xff]  ;;  %v2321_v9 = vpack.c.bf16 %v397_v6, %v394_v4  ;;  %v402_v12 = vld [vmem:[#allocation5 + $0x50] sm:$0xff]  ;;  %v400_v13 = vld [vmem:[#allocation5 + $0x40] sm:$0xff]  ;;  %s3819_s28 = scalar_lea.vmem [#allocation14], %s1915_s8  ;;  %s3836_s29 = scalar_lea.hbm %s3888_s7, %s1923_s14 }
  0xce   : > { %v2290_v10 = vpack.c.bf16 %v395_v8, %v392_v7  ;;  %v399_v11 = vld [vmem:[#allocation5 + $0x38] sm:$0xff]  ;;  %2289 = vmatprep.subr.bf16.mxu0 %v2288_v5  ;;  %v398_v16 = vld [vmem:[#allocation5 + $0x30] sm:$0xff]  ;;  %v401_v17 = vld [vmem:[#allocation5 + $0x48] sm:$0xff]  ;;  %s1769_s10 = sshll.u32 %s3819_s28, 4  ;;  %s1755_s20 = scalar_lea.sflag [#allocation4], %s3408_s21  ;;  %s3838_s10 = int_to_ptr.vmem [resolvable:$true] %s1769_s10 }
  0xcf   : > { %v2292_v14 = vpack.c.bf16 %v402_v12, %v399_v11  ;;  %v403_v15 = vld [vmem:[#allocation5 + $0x58] sm:$0xff]  ;;  %2322 = vmatpush3.bf16.msra.mxu1 %v2321_v9  ;;  %v2294_v19 = vpack.c.bf16 %v401_v17, %v398_v16  ;;  %v405_v20 = vld [vmem:[#allocation5 + $0x68] sm:$0xff]  ;;  %v408_v21 = vld [vmem:[#allocation5 + $0x80] sm:$0xff]  ;;  %s3014_s15 = scalar_lea.vmem %s3838_s10, 512  ;;  %p3910_p9 = scmp.ne.s32.totalorder %s3898_s22, 0 }
  0xd0   : > { %2291 = vmatpush1.bf16.msra.mxu0 %v2290_v10  ;;  %v2324_v18 = vpack.c.bf16 %v403_v15, %v400_v13  ;;  %v406_v22 = vld [vmem:[#allocation5 + $0x70] sm:$0xff]  ;;  %2323 = vmatprep.subr.bf16.mxu1 %v3103_v0  ;;  %v2296_v23 = vpack.c.bf16 %v408_v21, %v405_v20  ;;  %v409_v24 = vld [vmem:[#allocation5 + $0x88] sm:$0xff]  ;;  %v404_v25 = vld [vmem:[#allocation5 + $0x60] sm:$0xff]  ;;  %p3015_p6 = scmp.ne.s32.totalorder %s3838_s10, %s3014_s15  ;;  %s3106_s30 = smov [#allocation14]  }
  0xd1   : > { %2293 = vmatprep.subr.bf16.mxu0 %v2292_v14  ;;  %v407_v26 = vld [vmem:[#allocation5 + $0x78] sm:$0xff]  ;;  %v414_v28 = vld [vmem:[#allocation5 + $0xb0] sm:$0xff]  ;;  %v2327_v29 = vpack.c.bf16 %v409_v24, %v406_v22  ;;  %v412_v31 = vld [vmem:[#allocation5 + $0xa0] sm:$0xff]  ;;  %s3018_s16 = sshll.u32 %s3106_s30, 4  ;;  %s3019_s16 = int_to_ptr.vmem [resolvable:$false] %s3018_s16 }
  0xd2   : > { %v411_v27 = vld [vmem:[#allocation5 + $0x98] sm:$0xff]  ;;  %v2298_v30 = vpack.c.bf16 %v407_v26, %v404_v25  ;;  %v410_v34 = vld [vmem:[#allocation5 + $0x90] sm:$0xff]  ;;  %v413_v35 = vld [vmem:[#allocation5 + $0xa8] sm:$0xff]  ;;  %p3016_p12 = pnand %p3015_p6, %p3910_p9  ;;  %s3020_s17 = scalar_lea.vmem %s3019_s16, 1024 }
  0xd3   : > { %2325 = vmatpush3.bf16.msra.mxu1 %v2324_v18  ;;  %v2300_v32 = vpack.c.bf16 %v414_v28, %v411_v27  ;;  %v415_v33 = vld [vmem:[#allocation5 + $0xb8] sm:$0xff]  ;;  %v417_v36 = vld [vmem:[#allocation5 + $0xc8] sm:$0xff]  ;;  %v420_v37 = vld [vmem:[#allocation5 + $0xe0] sm:$0xff]  ;;  %v2302_v39 = vpack.c.bf16 %v413_v35, %v410_v34  ;;  %p3021_p1 = scmp.lt.s32.totalorder %s3838_s10, %s3019_s16  ;;  %p3022_p3 = scmp.lt.s32.totalorder %s3020_s17, %s3014_s15 }
  0xd4   : > { %2295 = vmatpush1.bf16.msra.mxu0 %v2294_v19  ;;  %2326 = vmatprep.subr.bf16.mxu1 %v3103_v0  ;;  %v2330_v38 = vpack.c.bf16 %v415_v33, %v412_v31  ;;  %v418_v40 = vld [vmem:[#allocation5 + $0xd0] sm:$0xff]  ;;  %v2304_v41 = vpack.c.bf16 %v420_v37, %v417_v36  ;;  %v421_v42 = vld [vmem:[#allocation5 + $0xe8] sm:$0xff]  ;;  %v416_v43 = vld [vmem:[#allocation5 + $0xc0] sm:$0xff]  ;;  %p3017_p13 = pneg %p3016_p12 }
  0xd5   : > { %2297 = vmatprep.subr.bf16.mxu0 %v2296_v23  ;;  %v419_v44 = vld [vmem:[#allocation5 + $0xd8] sm:$0xff]  ;;  %v426_v46 = vld [vmem:[#allocation5 + $0x110] sm:$0xff]  ;;  %v2333_v47 = vpack.c.bf16 %v421_v42, %v418_v40  ;;  %v424_v49 = vld [vmem:[#allocation5 + $0x100] sm:$0xff]  ;;  %p3023_p2 = por %p3022_p3, %p3021_p1 }
  0xd6   : > { %v423_v45 = vld [vmem:[#allocation5 + $0xf8] sm:$0xff]  ;;  %v2306_v48 = vpack.c.bf16 %v419_v44, %v416_v43  ;;  %v422_v52 = vld [vmem:[#allocation5 + $0xf0] sm:$0xff]  ;;  %v425_v53 = vld [vmem:[#allocation5 + $0x108] sm:$0xff] }
  0xd7   : > { %2328 = vmatpush3.bf16.msra.mxu1 %v2327_v29  ;;  %v2308_v50 = vpack.c.bf16 %v426_v46, %v423_v45  ;;  %v427_v51 = vld [vmem:[#allocation5 + $0x118] sm:$0xff]  ;;  %v429_v54 = vld [vmem:[#allocation5 + $0x128] sm:$0xff]  ;;  %v432_v55 = vld [vmem:[#allocation5 + $0x140] sm:$0xff]  ;;  %v2310_v57 = vpack.c.bf16 %v425_v53, %v422_v52  ;;  %p3024_p0 = pnand %p3023_p2, %p3017_p13 }
  0xd8   : > { %2299 = vmatpush1.bf16.msra.mxu0 %v2298_v30  ;;  %2329 = vmatprep.subr.bf16.mxu1 %v3103_v0  ;;  %v2336_v56 = vpack.c.bf16 %v427_v51, %v424_v49  ;;  %v430_v58 = vld [vmem:[#allocation5 + $0x130] sm:$0xff]  ;;  %v2312_v59 = vpack.c.bf16 %v432_v55, %v429_v54  ;;  %v433_v60 = vld [vmem:[#allocation5 + $0x148] sm:$0xff]  ;;  %v428_v61 = vld [vmem:[#allocation5 + $0x120] sm:$0xff] }
  0xd9   : > { %2301 = vmatprep.subr.bf16.mxu0 %v2300_v32  ;;  %v431_v62 = vld [vmem:[#allocation5 + $0x138] sm:$0xff]  ;;  %v438_v2 = vld [vmem:[#allocation5 + $0x170] sm:$0xff]  ;;  %v2339_v3 = vpack.c.bf16 %v433_v60, %v430_v58  ;;  %v436_v5 = vld [vmem:[#allocation5 + $0x160] sm:$0xff] }
  0xda   : > { %v435_v63 = vld [vmem:[#allocation5 + $0x158] sm:$0xff]  ;;  %v2314_v4 = vpack.c.bf16 %v431_v62, %v428_v61  ;;  %v434_v8 = vld [vmem:[#allocation5 + $0x150] sm:$0xff]  ;;  %v437_v9 = vld [vmem:[#allocation5 + $0x168] sm:$0xff] }
  0xdb   : > { %2331 = vmatpush3.bf16.msra.mxu1 %v2330_v38  ;;  %v2316_v6 = vpack.c.bf16 %v438_v2, %v435_v63  ;;  %v439_v7 = vld [vmem:[#allocation5 + $0x178] sm:$0xff]  ;;  %v2318_v11 = vpack.c.bf16 %v437_v9, %v434_v8  ;;  %v648_v13 = vld [vmem:[#allocation8 + $0x8] sm:$0xff]  ;;  %v651_v14 = vld [vmem:[#allocation8 + $0x20] sm:$0xff] }
  0xdc   : > { %2303 = vmatpush1.bf16.msra.mxu0 %v2302_v39  ;;  %2332 = vmatprep.subr.bf16.mxu1 %v3103_v0  ;;  %v2342_v10 = vpack.c.bf16 %v439_v7, %v436_v5  ;;  %v375_v12 = vld [vmem:[%s3412_s18] sm:$0xff]  ;;  %v3446_v15 = vpack.c.bf16 %v651_v14, %v648_v13  ;;  %v647_v16 = vld [vmem:[#allocation8] sm:$0xff] }
  0xdd   : > { %2305 = vmatprep.subr.bf16.mxu0 %v2304_v41  ;;  %v650_v17 = vld [vmem:[#allocation8 + $0x18] sm:$0xff]  ;;  %v649_v18 = vld [vmem:[#allocation8 + $0x10] sm:$0xff]  ;;  %v652_v20 = vld [vmem:[#allocation8 + $0x28] sm:$0xff] }
  0xde   : > { %v3448_v19 = vpack.c.bf16 %v650_v17, %v647_v16  ;;  %v3451_v21 = vpack.c.bf16 %v652_v20, %v649_v18  ;;  %v654_v22 = vld [vmem:[#allocation8 + $0x38] sm:$0xff]  ;;  %v657_v23 = vld [vmem:[#allocation8 + $0x50] sm:$0xff]  ;;  %v656_v26 = vld [vmem:[#allocation8 + $0x48] sm:$0xff] }
  0xdf   : > { %2334 = vmatpush3.bf16.msra.mxu1 %v2333_v47  ;;  %v3455_v24 = vpack.c.bf16 %v657_v23, %v654_v22  ;;  %v653_v25 = vld [vmem:[#allocation8 + $0x30] sm:$0xff]  ;;  %v655_v27 = vld [vmem:[#allocation8 + $0x40] sm:$0xff]  ;;  %v658_v29 = vld [vmem:[#allocation8 + $0x58] sm:$0xff] }
  0xe0   : > { %2307 = vmatpush1.bf16.msra.mxu0 %v2306_v48  ;;  %2335 = vmatprep.subr.bf16.mxu1 %v3103_v0  ;;  %v3458_v28 = vpack.c.bf16 %v656_v26, %v653_v25  ;;  %v3461_v30 = vpack.c.bf16 %v658_v29, %v655_v27  ;;  %v660_v31 = vld [vmem:[#allocation8 + $0x68] sm:$0xff]  ;;  %v663_v32 = vld [vmem:[#allocation8 + $0x80] sm:$0xff]  ;;  %v662_v35 = vld [vmem:[#allocation8 + $0x78] sm:$0xff]  ;;  %v376_v27 = vlaneseq }
  0xe1   : > { %2309 = vmatprep.subr.bf16.mxu0 %v2308_v50  ;;  %v3465_v33 = vpack.c.bf16 %v663_v32, %v660_v31  ;;  %v659_v34 = vld [vmem:[#allocation8 + $0x60] sm:$0xff]  ;;  %v661_v36 = vld [vmem:[#allocation8 + $0x70] sm:$0xff]  ;;  %v664_v38 = vld [vmem:[#allocation8 + $0x88] sm:$0xff] }
  0xe2   : > { %v3468_v37 = vpack.c.bf16 %v662_v35, %v659_v34  ;;  %v3471_v39 = vpack.c.bf16 %v664_v38, %v661_v36  ;;  %v666_v40 = vld [vmem:[#allocation8 + $0x98] sm:$0xff]  ;;  %v669_v41 = vld [vmem:[#allocation8 + $0xb0] sm:$0xff]  ;;  %v668_v44 = vld [vmem:[#allocation8 + $0xa8] sm:$0xff]  ;;  %v3527_v29 = vshrl.u32 %v376_v27, 7 }
  0xe3   : > { %2337 = vmatpush3.bf16.msra.mxu1 %v2336_v56  ;;  %v3475_v42 = vpack.c.bf16 %v669_v41, %v666_v40  ;;  %v665_v43 = vld [vmem:[#allocation8 + $0x90] sm:$0xff]  ;;  %v667_v45 = vld [vmem:[#allocation8 + $0xa0] sm:$0xff]  ;;  %v670_v47 = vld [vmem:[#allocation8 + $0xb8] sm:$0xff] }
  0xe4   : > { %2311 = vmatpush1.bf16.msra.mxu0 %v2310_v57  ;;  %2338 = vmatprep.subr.bf16.mxu1 %v3103_v0  ;;  %v3478_v46 = vpack.c.bf16 %v668_v44, %v665_v43  ;;  %v3481_v48 = vpack.c.bf16 %v670_v47, %v667_v45  ;;  %v672_v49 = vld [vmem:[#allocation8 + $0xc8] sm:$0xff]  ;;  %v675_v50 = vld [vmem:[#allocation8 + $0xe0] sm:$0xff]  ;;  %v674_v53 = vld [vmem:[#allocation8 + $0xd8] sm:$0xff]  ;;  %v382_v31 = vand.u32 7, %v3527_v29 }
  0xe5   : > { %2313 = vmatprep.subr.bf16.mxu0 %v2312_v59  ;;  %v3485_v51 = vpack.c.bf16 %v675_v50, %v672_v49  ;;  %v671_v52 = vld [vmem:[#allocation8 + $0xc0] sm:$0xff]  ;;  %v673_v54 = vld [vmem:[#allocation8 + $0xd0] sm:$0xff]  ;;  %v676_v56 = vld [vmem:[#allocation8 + $0xe8] sm:$0xff] }
  0xe6   : > { %v3488_v55 = vpack.c.bf16 %v674_v53, %v671_v52  ;;  %v3491_v57 = vpack.c.bf16 %v676_v56, %v673_v54  ;;  %v678_v58 = vld [vmem:[#allocation8 + $0xf8] sm:$0xff]  ;;  %v681_v59 = vld [vmem:[#allocation8 + $0x110] sm:$0xff]  ;;  %v680_v62 = vld [vmem:[#allocation8 + $0x108] sm:$0xff]  ;;  %vm3532_vm1 = vcmp.ne.s32.totalorder %v382_v31, 7  ;;  %vm391_vm8 = vcmp.ne.s32.totalorder %v382_v31, 0 }
  0xe7   : > { %2340 = vmatpush3.bf16.msra.mxu1 %v2339_v3  ;;  %v3495_v60 = vpack.c.bf16 %v681_v59, %v678_v58  ;;  %v677_v61 = vld [vmem:[#allocation8 + $0xf0] sm:$0xff]  ;;  %v679_v63 = vld [vmem:[#allocation8 + $0x100] sm:$0xff]  ;;  %v682_v3 = vld [vmem:[#allocation8 + $0x118] sm:$0xff] }
  0xe8   : > { %2315 = vmatpush1.bf16.msra.mxu0 %v2314_v4  ;;  %2341 = vmatprep.subr.bf16.mxu1 %v3103_v0  ;;  %v3498_v2 = vpack.c.bf16 %v680_v62, %v677_v61  ;;  %v3501_v4 = vpack.c.bf16 %v682_v3, %v679_v63  ;;  %v684_v5 = vld [vmem:[#allocation8 + $0x128] sm:$0xff]  ;;  %v683_v8 = vld [vmem:[#allocation8 + $0x120] sm:$0xff]  ;;  %v686_v9 = vld [vmem:[#allocation8 + $0x138] sm:$0xff] }
  0xe9   : > { %2317 = vmatprep.subr.bf16.mxu0 %v2316_v6  ;;  %v687_v6 = vld [vmem:[#allocation8 + $0x140] sm:$0xff]  ;;  %v690_v14 = vld [vmem:[#allocation8 + $0x158] sm:$0xff]  ;;  %v693_v16 = vld [vmem:[#allocation8 + $0x170] sm:$0xff] }
  0xea   : > { %v3505_v7 = vpack.c.bf16 %v687_v6, %v684_v5  ;;  %v3515_v17 = vpack.c.bf16 %v693_v16, %v690_v14  ;;  %v689_v18 = vld [vmem:[#allocation8 + $0x150] sm:$0xff]  ;;  %v692_v20 = vld [vmem:[#allocation8 + $0x168] sm:$0xff]  ;;  %v691_v22 = vld [vmem:[#allocation8 + $0x160] sm:$0xff] }
  0xeb   : > { %2343 = vmatpush3.bf16.msra.mxu1 %v2342_v10  ;;  %v685_v10 = vld [vmem:[#allocation8 + $0x130] sm:$0xff]  ;;  %v3518_v23 = vpack.c.bf16 %v692_v20, %v689_v18  ;;  %v694_v25 = vld [vmem:[#allocation8 + $0x178] sm:$0xff] }
  0xec   : > { %2319 = vmatpush1.bf16.msra.mxu0 %v2318_v11  ;;  %2376 = vmatprep.subr.bf16.mxu1 %v3103_v0  ;;  %v3508_v11 = vpack.c.bf16 %v686_v9, %v683_v8  ;;  %v3521_v26 = vpack.c.bf16 %v694_v25, %v691_v22  ;;  %v1916_v32 = vld [vmem:[#allocation7] ss:$0 sm:$0xff] }
  0xed   : > { %2345 = vmatprep.subr.bf16.mxu0 %v3446_v15 }
  0xee   : > { %2076 = vmatmul.mubr.f32.vlgmr.msra.gmra.mrb[0].mxu1 %v375_v12 }
  0xef   : > { %505 = vmatmul.mubr.f32.vlgmr.msra.gmra.mrb[0].mxu0 %v375_v12  ;;  %2110 = vmatprep.mubr.msk.f32.mxu1 %vm3104_vm0, %v3105_v1  ;;  %v688_v12 = vld [vmem:[#allocation8 + $0x148] sm:$0xff] }
  0xf0   : > { %759 = vmatprep.mubr.f32.mxu0 %v3105_v1  ;;  %2347 = vmatpush1.bf16.msra.mxu0 %v3448_v19  ;;  %v3511_v13 = vpack.c.bf16 %v688_v12, %v685_v10 }
  0xf1   : > { %2378 = vmatpush3.bf16.msra.mxu1 %v3451_v21  ;;  %2349 = vmatprep.subr.bf16.mxu0 %v3455_v24 }
  0xf2   : > { %2379 = vmatprep.subr.bf16.mxu1 %v3103_v0 }
  0xf4   : > { %2351 = vmatpush1.bf16.msra.mxu0 %v3458_v28 }
  0xf5   : > { %2381 = vmatpush3.bf16.msra.mxu1 %v3461_v30  ;;  %2353 = vmatprep.subr.bf16.mxu0 %v3465_v33 }
  0xf6   : > { %2382 = vmatprep.subr.bf16.mxu1 %v3103_v0 }
  0xf8   : > { %2355 = vmatpush1.bf16.msra.mxu0 %v3468_v37 }
  0xf9   : > { %2384 = vmatpush3.bf16.msra.mxu1 %v3471_v39  ;;  %2357 = vmatprep.subr.bf16.mxu0 %v3475_v42 }
  0xfa   : > { %2385 = vmatprep.subr.bf16.mxu1 %v3103_v0 }
  0xfc   : > { %2359 = vmatpush1.bf16.msra.mxu0 %v3478_v46 }
  0xfd   : > { %2387 = vmatpush3.bf16.msra.mxu1 %v3481_v48  ;;  %2361 = vmatprep.subr.bf16.mxu0 %v3485_v51 }
  0xfe   : > { %2388 = vmatprep.subr.bf16.mxu1 %v3103_v0 }
 0x100   : > { %2363 = vmatpush1.bf16.msra.mxu0 %v3488_v55 }
 0x101   : > { %2390 = vmatpush3.bf16.msra.mxu1 %v3491_v57  ;;  %2365 = vmatprep.subr.bf16.mxu0 %v3495_v60 }
 0x102   : > { %2391 = vmatprep.subr.bf16.mxu1 %v3103_v0 }
 0x104   : > { %2367 = vmatpush1.bf16.msra.mxu0 %v3498_v2 }
 0x105   : > { %2393 = vmatpush3.bf16.msra.mxu1 %v3501_v4  ;;  %2369 = vmatprep.subr.bf16.mxu0 %v3505_v7 }
 0x106   : > { %2394 = vmatprep.subr.bf16.mxu1 %v3103_v0 }
 0x108   : > { %2371 = vmatpush1.bf16.msra.mxu0 %v3508_v11 }
 0x109   : > { %2396 = vmatpush3.bf16.msra.mxu1 %v3511_v13  ;;  %2373 = vmatprep.subr.bf16.mxu0 %v3515_v17 }
 0x10a   : > { %2397 = vmatprep.subr.bf16.mxu1 %v3103_v0 }
 0x10c   : > { %2375 = vmatpush1.bf16.msra.mxu0 %v3518_v23 }
 0x10d   : > { %2399 = vmatpush3.bf16.msra.mxu1 %v3521_v26  ;;  %2401 = vmatprep.subr.bf16.mxu0 %v3446_v15 }
 0x10e   : > { %2432 = vmatprep.subr.bf16.mxu1 %v3103_v0 }
 0x1c1   : > { %v577_v34 = vpop.f32.mrb[0].mxu1 }
 0x1c2   : > { %v506_v35 = vpop.f32.mrb[0].mxu0  ;;  %v616_v38 = vrot.slane %v577_v34, 1  ;;  %v2077_v15 = vpop.f32.mrb[1].mxu1 }
 0x1c3   : > { %v588_v40 = vadd.f32 %v1916_v32, %v506_v35  ;;  %v508_v41 = vpop.f32.mrb[1].mxu0 }
 0x1c4   : > { %v617_v44 = vsel %vm3532_vm1, %v616_v38, 0.0 }
 0x1c5   : > { %v590_v43 = vmul.f32 0.70710677, %v588_v40  ;;  %v618_v45 = vadd.f32 %v617_v44, %v508_v41 }
 0x1c7   : > { %v591_v47 = vand.u32 2147483647, %v590_v43  ;;  %v3538_v49 = vadd.f32 %v1916_v32, %v618_v45  ;;  %vm611_vm2 = vcmp.lt.f32.partialorder %v590_v43, 0.0 }
 0x1c9   : > { %v592_v50 = vmul.f32 0.3275911, %v591_v47  ;;  %v3541_v52 = vmul.f32 0.70710677, %v3538_v49  ;;  %v605_v59 = vmul.f32 %v591_v47, %v591_v47 }
 0x1cb   : > { %v593_v53 = vadd.f32 1.0, %v592_v50  ;;  %v622_v54 = vand.u32 2147483647, %v3541_v52  ;;  %v606_v62 = vsub.f32 0.0, %v605_v59  ;;  %v589_v50 = vmul.f32 0.5, %v588_v40  ;;  %v1108_v40 = vld [vmem:[#allocation11 + $0x40] sm:$0xff] }
 0x1cc   : > { %vm642_vm3 = vcmp.lt.f32.partialorder %v3541_v52, 0.0 }
 0x1cd   : > { %2792 = vrcp.f32 %v593_v53  ;;  %v623_v56 = vmul.f32 0.3275911, %v622_v54  ;;  %v607_v5 = vmul.f32 1.442695, %v606_v62  ;;  %v636_v34 = vmul.f32 %v622_v54, %v622_v54  ;;  %v1116_v62 = vld [vmem:[#allocation11 + $0x80] sm:$0xff] }
 0x1cf   : > { %v624_v58 = vadd.f32 1.0, %v623_v56  ;;  %v637_v15 = vsub.f32 0.0, %v636_v34  ;;  %v1125_v34 = vld [vmem:[#allocation11 + $0xc8] sm:$0xff] }
 0x1d1   : > { %2794 = vrcp.f32 %v624_v58  ;;  %v638_v56 = vmul.f32 1.442695, %v637_v15  ;;  %v1127_v15 = vld [vmem:[#allocation11 + $0xd8] sm:$0xff] }
 0x1d2   : > { %2796 = vpow2.f32 %v607_v5  ;;  %v1115_v5 = vld [vmem:[#allocation11 + $0x78] sm:$0xff] }
 0x1d3   : > { %2798 = vpow2.f32 %v638_v56  ;;  %v1134_v56 = vld [vmem:[#allocation11 + $0x110] sm:$0xff] }
 0x1d7   : > { %v2793_v61 = vpop.eup %2792 }
 0x1d8   : > { %v596_v63 = vmul.f32 1.0614054, %v2793_v61 }
 0x1da   : > { %v597_v3 = vadd.f32 -1.4531521, %v596_v63 }
 0x1db   : > { %v2795_v6 = vpop.eup %2794 }
 0x1dc   : > { %v598_v8 = vmul.f32 %v2793_v61, %v597_v3  ;;  %v627_v9 = vmul.f32 1.0614054, %v2795_v6  ;;  %v2797_v32 = vpop.eup %2796  ;;  %v1112_v3 = vld [vmem:[#allocation11 + $0x60] sm:$0xff] }
 0x1de   : > { %v599_v10 = vadd.f32 1.4214138, %v598_v8  ;;  %v628_v14 = vadd.f32 -1.4531521, %v627_v9  ;;  %v3605_v8 = vpack.c.bf16 %v1115_v5, %v1112_v3  ;;  %v1117_v9 = vld [vmem:[#allocation11 + $0x88] sm:$0xff] }
 0x1e0   : > { %v600_v12 = vmul.f32 %v2793_v61, %v599_v10  ;;  %v629_v20 = vmul.f32 %v2795_v6, %v628_v14  ;;  %v1122_v14 = vld [vmem:[#allocation11 + $0xb0] sm:$0xff] }
 0x1e2   : > { %v601_v16 = vadd.f32 -0.28449672, %v600_v12  ;;  %v630_v27 = vadd.f32 1.4214138, %v629_v20  ;;  %v1119_v12 = vld [vmem:[#allocation11 + $0x98] sm:$0xff]  ;;  %v1121_v20 = vld [vmem:[#allocation11 + $0xa8] sm:$0xff] }
 0x1e4   : > { %v602_v18 = vmul.f32 %v2793_v61, %v601_v16  ;;  %v631_v41 = vmul.f32 %v2795_v6, %v630_v27  ;;  %v3612_v16 = vpack.c.bf16 %v1122_v14, %v1119_v12  ;;  %v1123_v27 = vld [vmem:[#allocation11 + $0xb8] sm:$0xff] }
 0x1e6   : > { %v603_v22 = vadd.f32 0.2548296, %v602_v18  ;;  %v632_v47 = vadd.f32 -0.28449672, %v631_v41  ;;  %v1118_v18 = vld [vmem:[#allocation11 + $0x90] sm:$0xff]  ;;  %v1124_v41 = vld [vmem:[#allocation11 + $0xc0] sm:$0xff] }
 0x1e8   : > { %v604_v25 = vmul.f32 %v2793_v61, %v603_v22  ;;  %v633_v59 = vmul.f32 %v2795_v6, %v632_v47  ;;  %v1113_v61 = vld [vmem:[#allocation11 + $0x68] sm:$0xff]  ;;  %v1120_v22 = vld [vmem:[#allocation11 + $0xa0] sm:$0xff] }
 0x1e9   : > { %v3602_v63 = vpack.c.bf16 %v1116_v62, %v1113_v61  ;;  %v1129_v47 = vld [vmem:[#allocation11 + $0xe8] sm:$0xff]  ;;  %v1917_v62 = vld [vmem:[#allocation10] ss:$0 sm:$0xff] }
 0x1ea   : > { %v609_v35 = vmul.f32 %v2797_v32, %v604_v25  ;;  %v634_v54 = vadd.f32 0.2548296, %v633_v59  ;;  %v3616_v25 = vpack.c.bf16 %v1121_v20, %v1118_v18  ;;  %v3618_v32 = vpack.c.bf16 %v1123_v27, %v1120_v22  ;;  %v1130_v59 = vld [vmem:[#allocation11 + $0xf0] sm:$0xff] }
 0x1ec   : > { %v610_v38 = vsub.f32 1.0, %v609_v35  ;;  %v1128_v35 = vld [vmem:[#allocation11 + $0xe0] sm:$0xff] }
 0x1ee   : > { %v612_v44 = vsub.f32 0.0, %v610_v38 }
 0x1f0   : > { %v613_v45 = vsel %vm611_vm2, %v612_v44, %v610_v38  ;;  %v3622_v38 = vpack.c.bf16 %v1128_v35, %v1125_v34  ;;  %v1126_v44 = vld [vmem:[#allocation11 + $0xd0] sm:$0xff] }
 0x1f1   : > { %v614_v53 = vadd.f32 1.0, %v613_v45  ;;  %v3625_v45 = vpack.c.bf16 %v1127_v15, %v1124_v41 }
 0x1f3   : > { %v615_v58 = vmul.f32 %v614_v53, %v589_v50  ;;  %v3628_v50 = vpack.c.bf16 %v1129_v47, %v1126_v44  ;;  %v1131_v53 = vld [vmem:[#allocation11 + $0xf8] sm:$0xff] }
 0x1f5   : > { %760 = vmatmul.mubr.f32.vlgmr.msra.gmra.mrb[2].mxu0 %v615_v58  ;;  %2111 = vmatmul.mubr.f32.vlgmr.msra.gmra.mrb[2].mxu1 %v615_v58  ;;  %v3632_v58 = vpack.c.bf16 %v1134_v56, %v1131_v53 }
 0x1f6   : > { %2403 = vmatpush1.bf16.msra.mxu0 %v3448_v19  ;;  %2434 = vmatpush3.bf16.msra.mxu1 %v3451_v21  ;;  %v635_v19 = vmul.f32 %v2795_v6, %v634_v54  ;;  %v2799_v21 = vpop.eup %2798  ;;  %v1114_v6 = vld [vmem:[#allocation11 + $0x70] sm:$0xff]  ;;  %v1133_v54 = vld [vmem:[#allocation11 + $0x108] sm:$0xff] }
 0x1f7   : > { %2405 = vmatprep.subr.bf16.mxu0 %v3455_v24  ;;  %2435 = vmatprep.subr.bf16.mxu1 %v3103_v0  ;;  %v3608_v10 = vpack.c.bf16 %v1117_v9, %v1114_v6 }
 0x1f8   : > { %900 = vmatprep.mubr.f32.mxu0 %v3105_v1  ;;  %2145 = vmatprep.mubr.msk.f32.mxu1 %vm3104_vm0, %v3105_v1  ;;  %v640_v24 = vmul.f32 %v2799_v21, %v635_v19  ;;  %v1132_v19 = vld [vmem:[#allocation11 + $0x100] sm:$0xff]  ;;  %v3635_v21 = vpack.c.bf16 %v1133_v54, %v1130_v59 }
 0x1fa   : > { %2407 = vmatpush1.bf16.msra.mxu0 %v3458_v28  ;;  %2437 = vmatpush3.bf16.msra.mxu1 %v3461_v30  ;;  %v641_v28 = vsub.f32 1.0, %v640_v24  ;;  %v1135_v24 = vld [vmem:[#allocation11 + $0x118] sm:$0xff] }
 0x1fb   : > { %2409 = vmatprep.subr.bf16.mxu0 %v3465_v33  ;;  %2438 = vmatprep.subr.bf16.mxu1 %v3103_v0 }
 0x1fc   : > { %v643_v30 = vsub.f32 0.0, %v641_v28 }
 0x1fe   : > { %2411 = vmatpush1.bf16.msra.mxu0 %v3468_v37  ;;  %2440 = vmatpush3.bf16.msra.mxu1 %v3471_v39  ;;  %v644_v33 = vsel %vm642_vm3, %v643_v30, %v641_v28  ;;  %v620_v39 = vmul.f32 0.5, %v3538_v49  ;;  %v1111_v49 = vld [vmem:[#allocation11 + $0x58] sm:$0xff]  ;;  %v3638_v28 = vpack.c.bf16 %v1135_v24, %v1132_v19  ;;  %v1137_v30 = vld [vmem:[#allocation11 + $0x128] sm:$0xff] }
 0x1ff   : > { %2413 = vmatprep.subr.bf16.mxu0 %v3475_v42  ;;  %2441 = vmatprep.subr.bf16.mxu1 %v3103_v0  ;;  %v645_v37 = vadd.f32 1.0, %v644_v33  ;;  %v3598_v52 = vpack.c.bf16 %v1111_v49, %v1108_v40  ;;  %v1140_v33 = vld [vmem:[#allocation11 + $0x140] sm:$0xff]  ;;  %v1147_v49 = vld [vmem:[#allocation11 + $0x178] sm:$0xff] }
 0x201   : > { %v646_v42 = vmul.f32 %v645_v37, %v620_v39  ;;  %v3642_v37 = vpack.c.bf16 %v1140_v33, %v1137_v30  ;;  %v1136_v39 = vld [vmem:[#allocation11 + $0x120] sm:$0xff] }
 0x202   : > { %2415 = vmatpush1.bf16.msra.mxu0 %v3478_v46  ;;  %2443 = vmatpush3.bf16.msra.mxu1 %v3481_v48  ;;  %v1101_v46 = vld [vmem:[#allocation11 + $0x8] sm:$0xff]  ;;  %v1104_v48 = vld [vmem:[#allocation11 + $0x20] sm:$0xff] }
 0x203   : > { %2417 = vmatprep.subr.bf16.mxu0 %v3485_v51  ;;  %2444 = vmatprep.subr.bf16.mxu1 %v3103_v0  ;;  %v3583_v51 = vpack.c.bf16 %v1104_v48, %v1101_v46  ;;  %v1138_v46 = vld [vmem:[#allocation11 + $0x130] sm:$0xff] }
 0x206   : > { %2419 = vmatpush1.bf16.msra.mxu0 %v3488_v55  ;;  %2446 = vmatpush3.bf16.msra.mxu1 %v3491_v57  ;;  %v1100_v55 = vld [vmem:[#allocation11] sm:$0xff]  ;;  %v1103_v57 = vld [vmem:[#allocation11 + $0x18] sm:$0xff] }
 0x207   : > { %2421 = vmatprep.subr.bf16.mxu0 %v3495_v60  ;;  %2447 = vmatprep.subr.bf16.mxu1 %v3103_v0  ;;  %v1102_v60 = vld [vmem:[#allocation11 + $0x10] sm:$0xff] }
 0x20a   : > { %2423 = vmatpush1.bf16.msra.mxu0 %v3498_v2  ;;  %2449 = vmatpush3.bf16.msra.mxu1 %v3501_v4  ;;  %v3585_v2 = vpack.c.bf16 %v1103_v57, %v1100_v55  ;;  %v1105_v4 = vld [vmem:[#allocation11 + $0x28] sm:$0xff] }
 0x20b   : > { %2425 = vmatprep.subr.bf16.mxu0 %v3505_v7  ;;  %2450 = vmatprep.subr.bf16.mxu1 %v3103_v0  ;;  %v3588_v7 = vpack.c.bf16 %v1105_v4, %v1102_v60  ;;  %v1141_v55 = vld [vmem:[#allocation11 + $0x148] sm:$0xff]  ;;  %v1143_v60 = vld [vmem:[#allocation11 + $0x158] sm:$0xff]  ;;  %v1146_v4 = vld [vmem:[#allocation11 + $0x170] sm:$0xff] }
 0x20c   : > { %v3648_v57 = vpack.c.bf16 %v1141_v55, %v1138_v46 }
 0x20e   : > { %2427 = vmatpush1.bf16.msra.mxu0 %v3508_v11  ;;  %2452 = vmatpush3.bf16.msra.mxu1 %v3511_v13  ;;  %v1107_v11 = vld [vmem:[#allocation11 + $0x38] sm:$0xff]  ;;  %v1110_v13 = vld [vmem:[#allocation11 + $0x50] sm:$0xff] }
 0x20f   : > { %2429 = vmatprep.subr.bf16.mxu0 %v3515_v17  ;;  %2453 = vmatprep.subr.bf16.mxu1 %v3103_v0  ;;  %v3592_v17 = vpack.c.bf16 %v1110_v13, %v1107_v11  ;;  %v3652_v11 = vpack.c.bf16 %v1146_v4, %v1143_v60  ;;  %v1142_v13 = vld [vmem:[#allocation11 + $0x150] sm:$0xff] }
 0x212   : > { %2431 = vmatpush1.bf16.msra.mxu0 %v3518_v23  ;;  %2455 = vmatpush3.bf16.msra.mxu1 %v3521_v26  ;;  %v1106_v23 = vld [vmem:[#allocation11 + $0x30] sm:$0xff]  ;;  %v1109_v26 = vld [vmem:[#allocation11 + $0x48] sm:$0xff] }
 0x213   : > { %2488 = vmatprep.subr.bf16.mxu1 %v3103_v0  ;;  %2457 = vmatprep.subr.bf16.mxu0 %v3583_v51  ;;  %v3595_v43 = vpack.c.bf16 %v1109_v26, %v1106_v23  ;;  %v1145_v23 = vld [vmem:[#allocation11 + $0x168] sm:$0xff]  ;;  %v1144_v26 = vld [vmem:[#allocation11 + $0x160] sm:$0xff] }
 0x214   : > { %v3655_v40 = vpack.c.bf16 %v1145_v23, %v1142_v13  ;;  %v3658_v61 = vpack.c.bf16 %v1147_v49, %v1144_v26 }
 0x215   : > { %901 = vmatmul.mubr.f32.vlgmr.msra.gmra.mrb[4].mxu0 %v646_v42  ;;  %2146 = vmatmul.mubr.f32.vlgmr.msra.gmra.mrb[4].mxu1 %v646_v42  ;;  %v1139_v42 = vld [vmem:[#allocation11 + $0x138] sm:$0xff] }
 0x216   : > { %1212 = vmatprep.mubr.f32.mxu0 %v3105_v1  ;;  %2180 = vmatprep.mubr.msk.f32.mxu1 %vm3104_vm0, %v3105_v1  ;;  %v3645_v48 = vpack.c.bf16 %v1139_v42, %v1136_v39 }
 0x217   : > { %2459 = vmatpush1.bf16.msra.mxu0 %v3585_v2  ;;  %2490 = vmatpush3.bf16.msra.mxu1 %v3588_v7 }
 0x218   : > { %2491 = vmatprep.subr.bf16.mxu1 %v3103_v0  ;;  %2461 = vmatprep.subr.bf16.mxu0 %v3592_v17 }
 0x21b   : > { %2463 = vmatpush1.bf16.msra.mxu0 %v3595_v43  ;;  %2493 = vmatpush3.bf16.msra.mxu1 %v3598_v52 }
 0x21c   : > { %2494 = vmatprep.subr.bf16.mxu1 %v3103_v0  ;;  %2465 = vmatprep.subr.bf16.mxu0 %v3602_v63 }
 0x21f   : > { %2467 = vmatpush1.bf16.msra.mxu0 %v3605_v8  ;;  %2496 = vmatpush3.bf16.msra.mxu1 %v3608_v10 }
 0x220   : > { %2497 = vmatprep.subr.bf16.mxu1 %v3103_v0  ;;  %2469 = vmatprep.subr.bf16.mxu0 %v3612_v16 }
 0x223   : > { %2471 = vmatpush1.bf16.msra.mxu0 %v3616_v25  ;;  %2499 = vmatpush3.bf16.msra.mxu1 %v3618_v32 }
 0x224   : > { %2500 = vmatprep.subr.bf16.mxu1 %v3103_v0  ;;  %2473 = vmatprep.subr.bf16.mxu0 %v3622_v38 }
 0x227   : > { %2475 = vmatpush1.bf16.msra.mxu0 %v3625_v45  ;;  %2502 = vmatpush3.bf16.msra.mxu1 %v3628_v50 }
 0x228   : > { %2503 = vmatprep.subr.bf16.mxu1 %v3103_v0  ;;  %2477 = vmatprep.subr.bf16.mxu0 %v3632_v58 }
 0x22b   : > { %2479 = vmatpush1.bf16.msra.mxu0 %v3635_v21  ;;  %2505 = vmatpush3.bf16.msra.mxu1 %v3638_v28 }
 0x22c   : > { %2506 = vmatprep.subr.bf16.mxu1 %v3103_v0  ;;  %2481 = vmatprep.subr.bf16.mxu0 %v3642_v37 }
 0x22f   : > { %2483 = vmatpush1.bf16.msra.mxu0 %v3645_v48  ;;  %2508 = vmatpush3.bf16.msra.mxu1 %v3648_v57 }
 0x230   : > { %2509 = vmatprep.subr.bf16.mxu1 %v3103_v0  ;;  %2485 = vmatprep.subr.bf16.mxu0 %v3652_v11 }
 0x233   : > { %2487 = vmatpush1.bf16.msra.mxu0 %v3655_v40  ;;  %2511 = vmatpush3.bf16.msra.mxu1 %v3658_v61 }
 0x234   : > { %2513 = vmatprep.subr.bf16.mxu0 %v3583_v51  ;;  %2544 = vmatprep.subr.bf16.mxu1 %v3103_v0 }
 0x2c8   : > { %v761_v3 = vpop.f32.mrb[2].mxu0  ;;  %v832_v5 = vpop.f32.mrb[2].mxu1 }
 0x2c9   : > { %v984_v6 = vadd.f32 %v1917_v62, %v761_v3  ;;  %v763_v9 = vpop.f32.mrb[3].mxu0  ;;  %v2112_v12 = vpop.f32.mrb[3].mxu1  ;;  %v1069_v56 = vrot.slane %v832_v5, 1 }
 0x2cb   : > { %v986_v14 = vmul.f32 0.70710677, %v984_v6  ;;  %v1070_v42 = vsel %vm3532_vm1, %v1069_v56, 0.0 }
 0x2cd   : > { %v987_v18 = vand.u32 2147483647, %v986_v14  ;;  %vm1007_vm4 = vcmp.lt.f32.partialorder %v986_v14, 0.0 }
 0x2cf   : > { %v988_v20 = vmul.f32 0.3275911, %v987_v18  ;;  %v1001_v27 = vmul.f32 %v987_v18, %v987_v18 }
 0x2d1   : > { %v989_v22 = vadd.f32 1.0, %v988_v20  ;;  %v1002_v35 = vsub.f32 0.0, %v1001_v27 }
 0x2d3   : > { %2800 = vrcp.f32 %v989_v22  ;;  %v1003_v44 = vmul.f32 1.442695, %v1002_v35 }
 0x2d5   : > { %2802 = vpow2.f32 %v1003_v44  ;;  %v985_v44 = vmul.f32 0.5, %v984_v6 }
 0x2dd   : > { %v2801_v34 = vpop.eup %2800 }
 0x2de   : > { %v992_v41 = vmul.f32 1.0614054, %v2801_v34 }
 0x2e0   : > { %v993_v15 = vadd.f32 -1.4531521, %v992_v41 }
 0x2e2   : > { %v994_v47 = vmul.f32 %v2801_v34, %v993_v15 }
 0x2e4   : > { %v995_v53 = vadd.f32 1.4214138, %v994_v47 }
 0x2e6   : > { %v996_v59 = vmul.f32 %v2801_v34, %v995_v53 }
 0x2e8   : > { %v997_v54 = vadd.f32 -0.28449672, %v996_v59  ;;  %v902_v19 = vpop.f32.mrb[4].mxu0  ;;  %v973_v24 = vpop.f32.mrb[4].mxu1 }
 0x2e9   : > { %v3664_v30 = vadd.f32 %v1917_v62, %v902_v19  ;;  %v1012_v33 = vadd.f32 %v973_v24, %v763_v9  ;;  %v904_v39 = vpop.f32.mrb[5].mxu0  ;;  %v2147_v46 = vpop.f32.mrb[5].mxu1 }
 0x2ea   : > { %v998_v55 = vmul.f32 %v2801_v34, %v997_v54  ;;  %v1071_v60 = vadd.f32 %v1070_v42, %v904_v39  ;;  %v2803_v9 = vpop.eup %2802 }
 0x2eb   : > { %v3669_v4 = vmul.f32 0.70710677, %v3664_v30  ;;  %v3671_v13 = vadd.f32 %v1917_v62, %v1012_v33 }
 0x2ec   : > { %v999_v23 = vadd.f32 0.2548296, %v998_v55  ;;  %v3673_v26 = vadd.f32 %v1917_v62, %v1071_v60 }
 0x2ed   : > { %v3676_v49 = vand.u32 2147483647, %v3669_v4  ;;  %v3679_v3 = vmul.f32 0.70710677, %v3671_v13  ;;  %vm1064_vm6 = vcmp.lt.f32.partialorder %v3669_v4, 0.0  ;;  %v1042_v4 = vmul.f32 0.5, %v3664_v30 }
 0x2ee   : > { %v1000_v5 = vmul.f32 %v2801_v34, %v999_v23  ;;  %v3702_v42 = vmul.f32 0.70710677, %v3673_v26 }
 0x2ef   : > { %v1016_v12 = vand.u32 2147483647, %v3679_v3  ;;  %v1045_v20 = vmul.f32 0.3275911, %v3676_v49  ;;  %vm1036_vm5 = vcmp.lt.f32.partialorder %v3679_v3, 0.0 }
 0x2f0   : > { %v1005_v18 = vmul.f32 %v2803_v9, %v1000_v5  ;;  %v3709_v23 = vand.u32 2147483647, %v3702_v42  ;;  %vm1095_vm7 = vcmp.lt.f32.partialorder %v3702_v42, 0.0 }
 0x2f1   : > { %v1017_v22 = vmul.f32 0.3275911, %v1016_v12  ;;  %v1046_v15 = vadd.f32 1.0, %v1045_v20  ;;  %v1030_v34 = vmul.f32 %v1016_v12, %v1016_v12 }
 0x2f2   : > { %v1006_v27 = vsub.f32 1.0, %v1005_v18  ;;  %v1076_v18 = vmul.f32 0.3275911, %v3709_v23 }
 0x2f3   : > { %v1018_v35 = vadd.f32 1.0, %v1017_v22  ;;  %v1031_v14 = vsub.f32 0.0, %v1030_v34 }
 0x2f4   : > { %v1008_v41 = vsub.f32 0.0, %v1006_v27 }
 0x2f5   : > { %2804 = vrcp.f32 %v1018_v35  ;;  %v1032_v19 = vmul.f32 1.442695, %v1031_v14  ;;  %v1058_v35 = vmul.f32 %v3676_v49, %v3676_v49  ;;  %v1014_v14 = vmul.f32 0.5, %v3671_v13 }
 0x2f6   : > { %v1009_v62 = vsel %vm1007_vm4, %v1008_v41, %v1006_v27  ;;  %2806 = vrcp.f32 %v1046_v15  ;;  %v1077_v15 = vadd.f32 1.0, %v1076_v18 }
 0x2f7   : > { %v1010_v47 = vadd.f32 1.0, %v1009_v62  ;;  %2808 = vpow2.f32 %v1032_v19 }
 0x2f8   : > { %2810 = vrcp.f32 %v1077_v15 }
 0x2f9   : > { %v1011_v53 = vmul.f32 %v1010_v47, %v985_v44  ;;  %v1059_v47 = vsub.f32 0.0, %v1058_v35 }
 0x2fb   : > { %1213 = vmatmul.mubr.f32.vlgmr.msra.gmra.mrb[6].mxu0 %v1011_v53  ;;  %2181 = vmatmul.mubr.f32.vlgmr.msra.gmra.mrb[6].mxu1 %v1011_v53 }
 0x2fc   : > { %2515 = vmatpush1.bf16.msra.mxu0 %v3585_v2  ;;  %2546 = vmatpush3.bf16.msra.mxu1 %v3588_v7 }
 0x2fd   : > { %2517 = vmatprep.subr.bf16.mxu0 %v3592_v17  ;;  %2547 = vmatprep.subr.bf16.mxu1 %v3103_v0 }
 0x2fe   : > { %1353 = vmatprep.mubr.f32.mxu0 %v3105_v1  ;;  %2215 = vmatprep.mubr.msk.f32.mxu1 %vm3104_vm0, %v3105_v1 }
 0x2ff   : > { %v2805_v6 = vpop.eup %2804 }
 0x300   : > { %2519 = vmatpush1.bf16.msra.mxu0 %v3595_v43  ;;  %2549 = vmatpush3.bf16.msra.mxu1 %v3598_v52  ;;  %v1021_v56 = vmul.f32 1.0614054, %v2805_v6  ;;  %v3694_v59 = vpop.eup %2806 }
 0x301   : > { %2521 = vmatprep.subr.bf16.mxu0 %v3602_v63  ;;  %2550 = vmatprep.subr.bf16.mxu1 %v3103_v0  ;;  %v1049_v24 = vmul.f32 1.0614054, %v3694_v59  ;;  %v2809_v27 = vpop.eup %2808 }
 0x302   : > { %v1022_v54 = vadd.f32 -1.4531521, %v1021_v56  ;;  %v3742_v13 = vpop.eup %2810 }
 0x303   : > { %v1050_v46 = vadd.f32 -1.4531521, %v1049_v24 }
 0x304   : > { %2523 = vmatpush1.bf16.msra.mxu0 %v3605_v8  ;;  %2552 = vmatpush3.bf16.msra.mxu1 %v3608_v10  ;;  %v1023_v33 = vmul.f32 %v2805_v6, %v1022_v54 }
 0x305   : > { %2525 = vmatprep.subr.bf16.mxu0 %v3612_v16  ;;  %2553 = vmatprep.subr.bf16.mxu1 %v3103_v0  ;;  %v1051_v5 = vmul.f32 %v3694_v59, %v1050_v46 }
 0x306   : > { %v1024_v39 = vadd.f32 1.4214138, %v1023_v33  ;;  %v1080_v33 = vmul.f32 1.0614054, %v3742_v13 }
 0x307   : > { %v1052_v20 = vadd.f32 1.4214138, %v1051_v5 }
 0x308   : > { %2527 = vmatpush1.bf16.msra.mxu0 %v3616_v25  ;;  %2555 = vmatpush3.bf16.msra.mxu1 %v3618_v32  ;;  %v1025_v55 = vmul.f32 %v2805_v6, %v1024_v39 }
 0x309   : > { %2529 = vmatprep.subr.bf16.mxu0 %v3622_v38  ;;  %2556 = vmatprep.subr.bf16.mxu1 %v3103_v0  ;;  %v1053_v62 = vmul.f32 %v3694_v59, %v1052_v20 }
 0x30a   : > { %v1026_v60 = vadd.f32 -0.28449672, %v1025_v55  ;;  %v1081_v55 = vadd.f32 -1.4531521, %v1080_v33 }
 0x30b   : > { %v1054_v49 = vadd.f32 -0.28449672, %v1053_v62  ;;  %v1736_v62 = vsub.s32 2, %v3527_v29 }
 0x30c   : > { %2531 = vmatpush1.bf16.msra.mxu0 %v3625_v45  ;;  %2558 = vmatpush3.bf16.msra.mxu1 %v3628_v50  ;;  %v1027_v9 = vmul.f32 %v2805_v6, %v1026_v60  ;;  %v1082_v60 = vmul.f32 %v3742_v13, %v1081_v55 }
 0x30d   : > { %2533 = vmatprep.subr.bf16.mxu0 %v3632_v58  ;;  %2559 = vmatprep.subr.bf16.mxu1 %v3103_v0  ;;  %v1055_v19 = vmul.f32 %v3694_v59, %v1054_v49 }
 0x30e   : > { %v1028_v12 = vadd.f32 0.2548296, %v1027_v9  ;;  %v1083_v9 = vadd.f32 1.4214138, %v1082_v60 }
 0x30f   : > { %v1056_v3 = vadd.f32 0.2548296, %v1055_v19 }
 0x310   : > { %2535 = vmatpush1.bf16.msra.mxu0 %v3635_v21  ;;  %2561 = vmatpush3.bf16.msra.mxu1 %v3638_v28  ;;  %v1029_v22 = vmul.f32 %v2805_v6, %v1028_v12  ;;  %v1060_v6 = vmul.f32 1.442695, %v1059_v47  ;;  %v1089_v12 = vmul.f32 %v3709_v23, %v3709_v23  ;;  %v1084_v20 = vmul.f32 %v3742_v13, %v1083_v9 }
 0x311   : > { %2537 = vmatprep.subr.bf16.mxu0 %v3642_v37  ;;  %2562 = vmatprep.subr.bf16.mxu1 %v3103_v0  ;;  %v1057_v24 = vmul.f32 %v3694_v59, %v1056_v3 }
 0x312   : > { %v1034_v41 = vmul.f32 %v2809_v27, %v1029_v22  ;;  %2812 = vpow2.f32 %v1060_v6  ;;  %v1090_v22 = vsub.f32 0.0, %v1089_v12  ;;  %v1085_v23 = vadd.f32 -0.28449672, %v1084_v20 }
 0x314   : > { %2539 = vmatpush1.bf16.msra.mxu0 %v3645_v48  ;;  %2564 = vmatpush3.bf16.msra.mxu1 %v3648_v57  ;;  %v1035_v44 = vsub.f32 1.0, %v1034_v41  ;;  %v1091_v35 = vmul.f32 1.442695, %v1090_v22  ;;  %v1086_v15 = vmul.f32 %v3742_v13, %v1085_v23 }
 0x315   : > { %2541 = vmatprep.subr.bf16.mxu0 %v3652_v11  ;;  %2565 = vmatprep.subr.bf16.mxu1 %v3103_v0 }
 0x316   : > { %v1037_v53 = vsub.f32 0.0, %v1035_v44  ;;  %2814 = vpow2.f32 %v1091_v35  ;;  %v1087_v30 = vadd.f32 0.2548296, %v1086_v15 }
 0x318   : > { %2543 = vmatpush1.bf16.msra.mxu0 %v3655_v40  ;;  %2567 = vmatpush3.bf16.msra.mxu1 %v3658_v61  ;;  %v1038_v34 = vsel %vm1036_vm5, %v1037_v53, %v1035_v44  ;;  %v1740_v44 = vsub.s32 3, %v3527_v29 }
 0x319   : > { %2569 = vmatprep.subr.bf16.mxu0 %v3583_v51  ;;  %2600 = vmatprep.subr.bf16.mxu1 %v3103_v0  ;;  %v1039_v56 = vadd.f32 1.0, %v1038_v34  ;;  %v1728_v34 = vsub.s32 0, %v3527_v29 }
 0x31b   : > { %v1040_v54 = vmul.f32 %v1039_v56, %v1014_v14 }
 0x31c   : > { %v2813_v39 = vpop.eup %2812 }
 0x31d   : > { %1354 = vmatmul.mubr.f32.vlgmr.msra.gmra.mrb[8].mxu0 %v1040_v54  ;;  %2216 = vmatmul.mubr.f32.vlgmr.msra.gmra.mrb[8].mxu1 %v1040_v54  ;;  %v1062_v46 = vmul.f32 %v2813_v39, %v1057_v24 }
 0x31e   : > { %2571 = vmatpush1.bf16.msra.mxu0 %v3585_v2  ;;  %2602 = vmatpush3.bf16.msra.mxu1 %v3588_v7 }
 0x31f   : > { %2573 = vmatprep.subr.bf16.mxu0 %v3592_v17  ;;  %2603 = vmatprep.subr.bf16.mxu1 %v3103_v0  ;;  %v1063_v59 = vsub.f32 1.0, %v1062_v46 }
 0x320   : > { %1494 = vmatprep.mubr.f32.mxu0 %v3105_v1  ;;  %2250 = vmatprep.mubr.msk.f32.mxu1 %vm3104_vm0, %v3105_v1 }
 0x321   : > { %v1065_v5 = vsub.f32 0.0, %v1063_v59 }
 0x322   : > { %2575 = vmatpush1.bf16.msra.mxu0 %v3595_v43  ;;  %2605 = vmatpush3.bf16.msra.mxu1 %v3598_v52 }
 0x323   : > { %2577 = vmatprep.subr.bf16.mxu0 %v3602_v63  ;;  %2606 = vmatprep.subr.bf16.mxu1 %v3103_v0  ;;  %v1066_v18 = vsel %vm1064_vm6, %v1065_v5, %v1063_v59 }
 0x324   : > { %v1067_v27 = vadd.f32 1.0, %v1066_v18 }
 0x326   : > { %2579 = vmatpush1.bf16.msra.mxu0 %v3605_v8  ;;  %2608 = vmatpush3.bf16.msra.mxu1 %v3608_v10  ;;  %v1068_v41 = vmul.f32 %v1067_v27, %v1042_v4 }
 0x327   : > { %2581 = vmatprep.subr.bf16.mxu0 %v3612_v16  ;;  %2609 = vmatprep.subr.bf16.mxu1 %v3103_v0 }
 0x32a   : > { %2583 = vmatpush1.bf16.msra.mxu0 %v3616_v25  ;;  %2611 = vmatpush3.bf16.msra.mxu1 %v3618_v32 }
 0x32b   : > { %2585 = vmatprep.subr.bf16.mxu0 %v3622_v38  ;;  %2612 = vmatprep.subr.bf16.mxu1 %v3103_v0 }
 0x32e   : > { %2587 = vmatpush1.bf16.msra.mxu0 %v3625_v45  ;;  %2614 = vmatpush3.bf16.msra.mxu1 %v3628_v50 }
 0x32f   : > { %2589 = vmatprep.subr.bf16.mxu0 %v3632_v58  ;;  %2615 = vmatprep.subr.bf16.mxu1 %v3103_v0 }
 0x332   : > { %2591 = vmatpush1.bf16.msra.mxu0 %v3635_v21  ;;  %2617 = vmatpush3.bf16.msra.mxu1 %v3638_v28 }
 0x333   : > { %2593 = vmatprep.subr.bf16.mxu0 %v3642_v37  ;;  %2618 = vmatprep.subr.bf16.mxu1 %v3103_v0 }
 0x336   : > { %2595 = vmatpush1.bf16.msra.mxu0 %v3645_v48  ;;  %2620 = vmatpush3.bf16.msra.mxu1 %v3648_v57 }
 0x337   : > { %2597 = vmatprep.subr.bf16.mxu0 %v3652_v11  ;;  %2621 = vmatprep.subr.bf16.mxu1 %v3103_v0 }
 0x33a   : > { %2599 = vmatpush1.bf16.msra.mxu0 %v3655_v40  ;;  %2623 = vmatpush3.bf16.msra.mxu1 %v3658_v61 }
 0x33b   : > { %2625 = vmatprep.subr.bf16.mxu0 %v3583_v51  ;;  %2656 = vmatprep.subr.bf16.mxu1 %v3103_v0  ;;  %v1088_v51 = vmul.f32 %v3742_v13, %v1087_v30 }
 0x33d   : > { %1495 = vmatmul.mubr.f32.vlgmr.msra.gmra.mrb[10].mxu0 %v1068_v41  ;;  %2251 = vmatmul.mubr.f32.vlgmr.msra.gmra.mrb[10].mxu1 %v1068_v41 }
 0x33e   : > { %2627 = vmatpush1.bf16.msra.mxu0 %v3585_v2  ;;  %2658 = vmatpush3.bf16.msra.mxu1 %v3588_v7  ;;  %v2815_v2 = vpop.eup %2814 }
 0x33f   : > { %2629 = vmatprep.subr.bf16.mxu0 %v3592_v17  ;;  %2659 = vmatprep.subr.bf16.mxu1 %v3103_v0 }
 0x340   : > { %1635 = vmatprep.mubr.f32.mxu0 %v3105_v1  ;;  %2285 = vmatprep.mubr.msk.f32.mxu1 %vm3104_vm0, %v3105_v1  ;;  %v1093_v1 = vmul.f32 %v2815_v2, %v1088_v51 }
 0x342   : > { %2631 = vmatpush1.bf16.msra.mxu0 %v3595_v43  ;;  %2661 = vmatpush3.bf16.msra.mxu1 %v3598_v52  ;;  %v1094_v7 = vsub.f32 1.0, %v1093_v1 }
 0x343   : > { %2633 = vmatprep.subr.bf16.mxu0 %v3602_v63  ;;  %2662 = vmatprep.subr.bf16.mxu1 %v3103_v0  ;;  %v1073_v63 = vmul.f32 0.5, %v3673_v26 }
 0x344   : > { %v1096_v17 = vsub.f32 0.0, %v1094_v7 }
 0x346   : > { %2635 = vmatpush1.bf16.msra.mxu0 %v3605_v8  ;;  %2664 = vmatpush3.bf16.msra.mxu1 %v3608_v10  ;;  %v1097_v43 = vsel %vm1095_vm7, %v1096_v17, %v1094_v7 }
 0x347   : > { %2637 = vmatprep.subr.bf16.mxu0 %v3612_v16  ;;  %2665 = vmatprep.subr.bf16.mxu1 %v3103_v0  ;;  %v1098_v52 = vadd.f32 1.0, %v1097_v43 }
 0x349   : > { %v1099_v8 = vmul.f32 %v1098_v52, %v1073_v63 }
 0x34a   : > { %2639 = vmatpush1.bf16.msra.mxu0 %v3616_v25  ;;  %2667 = vmatpush3.bf16.msra.mxu1 %v3618_v32 }
 0x34b   : > { %2641 = vmatprep.subr.bf16.mxu0 %v3622_v38  ;;  %2668 = vmatprep.subr.bf16.mxu1 %v3103_v0 }
 0x34e   : > { %2643 = vmatpush1.bf16.msra.mxu0 %v3625_v45  ;;  %2670 = vmatpush3.bf16.msra.mxu1 %v3628_v50 }
 0x34f   : > { %2645 = vmatprep.subr.bf16.mxu0 %v3632_v58  ;;  %2671 = vmatprep.subr.bf16.mxu1 %v3103_v0 }
 0x352   : > { %2647 = vmatpush1.bf16.msra.mxu0 %v3635_v21  ;;  %2673 = vmatpush3.bf16.msra.mxu1 %v3638_v28  ;;  %v1724_v28 = vld [vmem:[#allocation13] sm:$0xf] }
 0x353   : > { %2649 = vmatprep.subr.bf16.mxu0 %v3642_v37  ;;  %2674 = vmatprep.subr.bf16.mxu1 %v3103_v0  ;;  %v1737_v53 = vrot.slane %v1724_v28, %v1736_v62  ;;  %v1741_v13 = vrot.slane %v1724_v28, %v1740_v44  ;;  %v1729_v46 = vrot.slane %v1724_v28, %v1728_v34 }
 0x356   : > { %2651 = vmatpush1.bf16.msra.mxu0 %v3645_v48  ;;  %2676 = vmatpush3.bf16.msra.mxu1 %v3648_v57 }
 0x357   : > { %2653 = vmatprep.subr.bf16.mxu0 %v3652_v11  ;;  %2677 = vmatprep.subr.bf16.mxu1 %v3103_v0  ;;  %v1732_v0 = vsub.s32 1, %v3527_v29 }
 0x359   : > { %v1733_v37 = vrot.slane %v1724_v28, %v1732_v0 }
 0x35a   : > { %2655 = vmatpush1.bf16.msra.mxu0 %v3655_v40  ;;  %2679 = vmatpush3.bf16.msra.mxu1 %v3658_v61 }
 0x35d   : > { %1636 = vmatmul.mubr.f32.vlgmr.msra.gmra.mrb[12].mxu0 %v1099_v8  ;;  %2286 = vmatmul.mubr.f32.vlgmr.msra.gmra.mrb[12].mxu1 %v1099_v8 }
 0x3ce   : > { %v1214_v10 = vpop.f32.mrb[6].mxu0  ;;  %v1285_v16 = vpop.f32.mrb[6].mxu1 }
 0x3cf   : > { %v1216_v25 = vpop.f32.mrb[7].mxu0  ;;  %v2182_v32 = vpop.f32.mrb[7].mxu1  ;;  %v1721_v47 = vrot.slane %v1285_v16, 1 }
 0x3d1   : > { %v1722_v24 = vsel %vm3532_vm1, %v1721_v47, 0.0 }
 0x3f0   : > { %v1355_v38 = vpop.f32.mrb[8].mxu0  ;;  %v1426_v45 = vpop.f32.mrb[8].mxu1 }
 0x3f1   : > { %v1357_v50 = vpop.f32.mrb[9].mxu0  ;;  %v2217_v58 = vpop.f32.mrb[9].mxu1 }
 0x3f2   : > { %v1716_v21 = vadd.f32 %v1357_v50, %v1214_v10 }
 0x410   : > { %v1496_v48 = vpop.f32.mrb[10].mxu0  ;;  %v1567_v57 = vpop.f32.mrb[10].mxu1 }
 0x411   : > { %v1717_v11 = vadd.f32 %v1716_v21, %v1567_v57  ;;  %v1498_v40 = vpop.f32.mrb[11].mxu0  ;;  %v2252_v61 = vpop.f32.mrb[11].mxu1 }
 0x412   : > { %v1718_v26 = vadd.f32 %v1498_v40, %v1355_v38 }
 0x413   : > { %v1747_v42 = vadd.f32 %v1733_v37, %v1717_v11 }
 0x415   : > { %1751 = vst [vmem:[%s3819_s28 + $0x8] sm:$0xff] %v1747_v42 }
 0x430   : > { %v1637_v49 = vpop.f32.mrb[12].mxu0  ;;  %v1708_v6 = vpop.f32.mrb[12].mxu1 }
 0x431   : > { %v1712_v14 = vrot.slane %v1637_v49, 7  ;;  %v1719_v56 = vadd.f32 %v1718_v26, %v1708_v6  ;;  %v1639_v54 = vpop.f32.mrb[13].mxu0  ;;  %v2287_v19 = vpop.f32.mrb[13].mxu1 }
 0x432   : > { %v1720_v3 = vadd.f32 %v1639_v54, %v1496_v48 }
 0x433   : > { %v1713_v31 = vsel %vm391_vm8, %v1712_v14, 0.0  ;;  %v1748_v33 = vadd.f32 %v1737_v53, %v1719_v56 }
 0x434   : > { %v1714_v39 = vadd.f32 %v1713_v31, %v1216_v25  ;;  %v1723_v29 = vadd.f32 %v1722_v24, %v1720_v3 }
 0x435   : > { %1752 = vst [vmem:[%s3819_s28 + $0x10] sm:$0xff] %v1748_v33 }
 0x436   : > { %v1715_v55 = vadd.f32 %v1714_v39, %v1426_v45  ;;  %v1749_v59 = vadd.f32 %v1741_v13, %v1723_v29 }
 0x438   : > { %v1746_v60 = vadd.f32 %v1729_v46, %v1715_v55  ;;  %1753 = vst [vmem:[%s3819_s28 + $0x18] sm:$0xff] %v1749_v59 }
 0x43a   : > { %1750 = vst [vmem:[%s3819_s28] sm:$0xff] %v1746_v60 }
 0x43b   : > { %3027 = shalt.err (!%p3024_p0)
}
 0x43c   : > { %s3028_s21 = scalar_lea.hbm %s3836_s29, 512  ;;  %s3032_s8 = scalar_lea.hbm %s3888_s7, 1024 }
 0x43d   : > { %p3029_p4 = scmp.ne.s32.totalorder %s3836_s29, %s3028_s21  ;;  %p3033_p8 = scmp.lt.u32.totalorder %s3836_s29, %s3888_s7 }
 0x43e   : > { %p3034_p5 = scmp.lt.u32.totalorder %s3032_s8, %s3028_s21  ;;  %p3036_p6 = scmp.lt.u32.totalorder %s3028_s21, %s3836_s29 }
 0x43f   : > { %p3030_p10 = pnand %p3029_p4, %p3910_p9 }
 0x440   : > { %p3035_p7 = por %p3034_p5, %p3033_p8 }
 0x441   : > { %p3031_p11 = pneg %p3030_p10 }
 0x442   : > { %p3037_p12 = por %p3036_p6, %p3035_p7 }
 0x444   : > { %p3038_p13 = pnand %p3037_p12, %p3031_p11 }
 0x446   : > { %3041 = shalt.err (!%p3038_p13)
}
 0x447   : > { %2706 = dma.vmem_to_hbm [thread:$0]  (%p3910_p9), %s3838_s10, 512, %s3836_s29, %s1755_s20  }
 0x448 PF: > { %s1781_s19 = sand.u32 1, %s3080_s24   ;;  %p3911_p1 = scmp.ne.s32.totalorder %s3899_s12, 0 }
 0x449   : > { %p3912_p3 = scmp.ge.s32.totalorder %s3092_s27, 2  ;;  %s1782_s9 = scalar_lea.sflag [#allocation4], %s1781_s19 }
 0x44b   : > { %p2732_p2 = pnand %p3912_p3, %p3911_p1 }
 0x44d   : > { %3075 = dma.done.wait (!%p2732_p2), %s1782_s9, 512  }
 0x44e   : > { %3077 = vsyncadd (!%p2732_p2), %s1782_s9, 4294966784  ;;  %p23_p0 = scmp.ge.s32.totalorder %s3332_s11, 4   ;;  %s3913_s24 = smov %s3084_s25 }
 0x44f   : > { %s3914_s25 = smov %s3088_s26  ;;  %s3915_s26 = smov %s3343_s13 }
 0x450   : > { %s3916_s27 = smov %s3332_s11  ;;  %25 = sbr.rel (!%p23_p0) target bundleno = 8 (0x8), region = 117 }
 0x457   :  { %1787 = vsyncpa [#allocation3], 1 }
 0x458   :  { %1789 = vsyncpa [#allocation3 + $0x1], 1 }
 0x459   :  { %1790 = vsyncpa [#allocation6], 1 }
 0x45a   :  { %1791 = vsyncpa [#allocation9], 1 }
 0x45b   :  { %1792 = vsyncpa [#allocation12], 1 }
 0x45c   :  { %1793 = vsyncpa [#allocation4], 1 }
 0x45d   :  { %1795 = vsyncpa [#allocation4 + $0x1], 1 }

</bundles_post_ra>
